<compile_context>
chip_gen: v5e
topology: v5e:2x2
jax: 0.10.0
libtpu: 0.0.40
codegen_flags: <defaults>
</compile_context>

<pallas_src>
import functools

import jax
import jax.numpy as jnp
from jax.experimental import pallas as pl
from jax.experimental.pallas import tpu as pltpu


def _round_up(v, m):
    return (v + m - 1) // m * m


def _cpnn_forward_kernel(n_mlp_layers, neg_inv_temp, hidden_size, feat_tile,
                         kw_resident, *refs):
    """Grid (batch_tiles, feature_chunks) kernel.

    refs = (x, kohonen_wT, x2, w2, [W_i, b_i] * (n_mlp_layers + 1),  # inputs
            out, winners,                                            # outputs
            xw_acc)                                                  # scratch
    """
    n_lin = n_mlp_layers + 1
    x_ref, kw_ref, x2_ref, w2_ref = refs[:4]
    lin_refs = refs[4:4 + 2 * n_lin]
    out_ref, win_ref, xw_acc = refs[4 + 2 * n_lin:]

    k = pl.program_id(1)
    nk = pl.num_programs(1)

    @pl.when(k == 0)
    def _init():
        xw_acc[...] = jnp.zeros_like(xw_acc)

    # Streaming loop body: ONLY a bf16 MXU matmul (norms are precomputed).
    x_bf = x_ref[...].astype(jnp.bfloat16)                  # (TB, TD)
    if kw_resident:
        off = pl.multiple_of(k * feat_tile, 128)
        kw_bf = kw_ref[pl.ds(off, feat_tile), :]            # (TD, H_pad)
    else:
        kw_bf = kw_ref[...]                                 # (TD, H_pad)
    xw_acc[...] += jnp.dot(x_bf, kw_bf, preferred_element_type=jnp.float32)

    @pl.when(k == nk - 1)
    def _finalize():
        x2 = x2_ref[...]                       # (TB, 1)  f32
        w2 = w2_ref[...]                       # (1, H_pad) f32
        xw = xw_acc[...]                       # (TB, H_pad)
        # ||x - w||^2 = ||x||^2 + ||w||^2 - 2 x.w ; clamp tiny negatives.
        d2 = jnp.maximum(x2 + w2 - 2.0 * xw, 0.0)

        hp = d2.shape[1]
        col = jax.lax.broadcasted_iota(jnp.int32, d2.shape, 1)
        valid = col < hidden_size

        # winners: argmin over real hidden units, first occurrence.
        big = jnp.float32(3.0e38)
        d2m = jnp.where(valid, d2, big)
        min_d2 = jnp.min(d2m, axis=1, keepdims=True)
        winners = jnp.min(jnp.where(d2m == min_d2, col, hp), axis=1,
                          keepdims=True).astype(jnp.int32)
        win_ref[...] = jnp.broadcast_to(winners, win_ref.shape)  # lane-dense

        # softmax(-dist / temperature) over the real hidden units only.
        dist = jnp.sqrt(d2)
        logits = jnp.where(valid, dist * neg_inv_temp, jnp.float32(-1.0e30))
        logits = logits - jnp.max(logits, axis=1, keepdims=True)
        e = jnp.exp(logits)
        inv = pl.reciprocal(jnp.sum(e, axis=1, keepdims=True), approx=True)
        a = e * inv                                          # pads are ~0

        # MLP: hidden layers (Linear + ReLU; dropout = identity), then head.
        for i in range(n_mlp_layers):
            w = lin_refs[2 * i][...]           # (in_p, out_p), zero-padded
            b = lin_refs[2 * i + 1][...]       # (1, out_p),    zero-padded
            a = jnp.maximum(
                jnp.dot(a, w, preferred_element_type=jnp.float32) + b, 0.0)
        w = lin_refs[2 * n_mlp_layers][...]
        b = lin_refs[2 * n_mlp_layers + 1][...]
        out_ref[...] = jnp.dot(a, w, preferred_element_type=jnp.float32) + b


def cpnn_forward(x, kohonen_weights, mlp_params, temperature,
                 *, batch_tile=256, feature_tile=4096):
    """Pallas wrapper. mlp_params: list of (W, b) with W shaped (out, in)."""
    B = x.shape[0]
    x_flat = jnp.reshape(x, (B, -1)).astype(jnp.float32)
    D = x_flat.shape[1]
    H = kohonen_weights.shape[0]
    n_lin = len(mlp_params)
    n_mlp_layers = n_lin - 1
    output_size = mlp_params[-1][0].shape[0]

    H_pad = _round_up(H, 128)
    OUT_pad = _round_up(output_size, 128)
    D128 = _round_up(D, 128)

    # --- MLP params: pre-transposed (in, out), zero-padded to x128 ----------
    flat_params = []
    param_bytes = 0
    for (w, b) in mlp_params:
        wt = jnp.asarray(w, jnp.float32).T                  # (in, out)
        in_d, out_d = wt.shape
        in_p = _round_up(in_d, 128)
        out_p = _round_up(out_d, 128)
        wp = jnp.pad(wt, ((0, in_p - in_d), (0, out_p - out_d)))
        bp = jnp.pad(jnp.asarray(b, jnp.float32).reshape(1, -1),
                     ((0, 0), (0, out_p - out_d)))
        flat_params += [wp, bp]
        param_bytes += int(wp.size) * 4 + 8 * out_p * 4     # sublane-padded bias

    # --- generation-aware VMEM budget ---------------------------------------
    try:
        phys = int(pltpu.get_tpu_info().vmem_capacity_bytes)
    except Exception:
        phys = 64 << 20                                     # v7x-safe default
    budget = max(min(phys - (16 << 20), (phys * 13) // 16), 32 << 20)
    kw_budget = phys // 4                                   # resident-codebook cap

    # --- tile geometry -------------------------------------------------------
    TB = min(batch_tile, _round_up(B, 16))                  # bf16: 16 sublanes
    if _round_up(B, TB) // TB < 2 and B >= 32:
        TB = _round_up((B + 1) // 2, 16)                    # feed both TCs
    B_pad = _round_up(B, TB)

    TD = min(_round_up(feature_tile, 128), D128)

    def _plan(tb, td):
        d_pad = _round_up(D128, td)
        kw_res = (d_pad * H_pad * 2) <= kw_budget
        fp = 2 * tb * td * 4                                # x (f32, dbl-buf)
        fp += (d_pad * H_pad * 2) if kw_res else (2 * td * H_pad * 2)
        fp += 2 * tb * 128 * 4                              # x2 blocks
        fp += 8 * H_pad * 4                                 # w2 (resident)
        fp += param_bytes                                   # MLP params (1 buf)
        fp += 2 * tb * OUT_pad * 4 + 2 * tb * 128 * 4       # outputs
        fp += tb * H_pad * 4                                # xw scratch
        return d_pad, kw_res, fp

    D_pad, kw_resident, fp = _plan(TB, TD)
    while fp + (6 << 20) > budget and TD > 512:             # shrink feature tile
        TD = max(512, _round_up(TD // 2, 128))
        D_pad, kw_resident, fp = _plan(TB, TD)
    while fp + (6 << 20) > budget and TB > 16:              # then batch tile
        TB = max(16, _round_up(TB // 2, 16))
        B_pad = _round_up(B, TB)
        D_pad, kw_resident, fp = _plan(TB, TD)

    vmem_limit = int(min(phys - (4 << 20), max(fp + (6 << 20), 32 << 20)))
    extra = param_bytes + (D_pad * H_pad * 2 if kw_resident else 0)
    vmem_limit_dblbuf = int(min(phys - (4 << 20),
                                max(fp + extra + (6 << 20), 32 << 20)))

    # --- inputs --------------------------------------------------------------
    if B_pad == B and D_pad == D:
        xp = x_flat                                          # no copy needed
    else:
        xp = jnp.pad(x_flat, ((0, B_pad - B), (0, D_pad - D)))

    x2 = jnp.sum(x_flat * x_flat, axis=1, keepdims=True)     # (B, 1) f32
    x2p = x2 if B_pad == B else jnp.pad(x2, ((0, B_pad - B), (0, 0)))

    kw_f = jnp.asarray(kohonen_weights, jnp.float32)
    w2p = jnp.pad(jnp.sum(kw_f * kw_f, axis=1).reshape(1, -1),
                  ((0, 0), (0, H_pad - H)))                  # (1, H_pad) f32
    kwT = jnp.pad(kw_f.T.astype(jnp.bfloat16),
                  ((0, D_pad - D), (0, H_pad - H)))          # (D_pad, H_pad)

    grid = (B_pad // TB, D_pad // TD)
    kernel = functools.partial(_cpnn_forward_kernel, n_mlp_layers,
                               -1.0 / float(temperature), H, TD, kw_resident)

    def _build(use_buffered, limit):
        def const_spec(shape):
            if use_buffered:
                return pl.BlockSpec(shape, lambda i, k: (0, 0),
                                    pipeline_mode=pl.Buffered(1))
            return pl.BlockSpec(shape, lambda i, k: (0, 0))

        if kw_resident:
            kw_spec = const_spec((D_pad, H_pad))             # VMEM-resident
        else:
            kw_spec = pl.BlockSpec((TD, H_pad), lambda i, k: (k, 0))

        in_specs = [
            pl.BlockSpec((TB, TD), lambda i, k: (i, k)),     # x tiles (f32)
            kw_spec,                                         # kohonen^T (bf16)
            pl.BlockSpec((TB, 1), lambda i, k: (i, 0)),      # ||x||^2
            const_spec((1, H_pad)),                          # ||w||^2
        ]
        for p in flat_params:
            in_specs.append(const_spec(p.shape))             # MLP weights

        out_specs = (
            pl.BlockSpec((TB, OUT_pad), lambda i, k: (i, 0)),
            pl.BlockSpec((TB, 128), lambda i, k: (i, 0)),    # lane-dense winners
        )

        return pl.pallas_call(
            kernel,
            grid=grid,
            out_shape=(
                jax.ShapeDtypeStruct((B_pad, OUT_pad), jnp.float32),
                jax.ShapeDtypeStruct((B_pad, 128), jnp.int32),
            ),
            in_specs=in_specs,
            out_specs=out_specs,
            scratch_shapes=[pltpu.VMEM((TB, H_pad), jnp.float32)],
            compiler_params=pltpu.CompilerParams(
                dimension_semantics=("parallel", "arbitrary"),
                vmem_limit_bytes=limit,
            ),
        )

    args = (xp, kwT, x2p, w2p, *flat_params)
    try:
        out, winners = _build(True, vmem_limit)(*args)
    except Exception:
        # Fallback if Buffered(1) is unsupported: default double buffering.
        out, winners = _build(False, vmem_limit_dblbuf)(*args)

    return out[:B, :output_size], winners[:B, 0], B


def cpnn_reference(x, kohonen_weights, mlp_params, temperature):
    """Pure-JAX reference mirroring the kernel math (bf16 operands in x.w^T)."""
    B = x.shape[0]
    x_f = jnp.reshape(x, (B, -1)).astype(jnp.float32)
    kw_f = jnp.asarray(kohonen_weights, jnp.float32)
    x2 = jnp.sum(x_f * x_f, axis=1, keepdims=True)
    w2 = jnp.sum(kw_f * kw_f, axis=1)[None, :]
    xw = jnp.dot(x_f.astype(jnp.bfloat16), kw_f.T.astype(jnp.bfloat16),
                 preferred_element_type=jnp.float32)
    d2 = jnp.maximum(x2 + w2 - 2.0 * xw, 0.0)
    winners = jnp.argmin(d2, axis=1).astype(jnp.int32)
    dist = jnp.sqrt(d2)
    a = jax.nn.softmax(-dist / temperature, axis=1)
    n_lin = len(mlp_params)
    for i, (w, b) in enumerate(mlp_params):
        z = jnp.dot(a, jnp.asarray(w, jnp.float32).T,
                    precision=jax.lax.Precision.HIGHEST) + jnp.asarray(b, jnp.float32)
        a = jnp.maximum(z, 0.0) if i < n_lin - 1 else z
    return a, winners


def init_params(key, input_size, hidden_size, hidden_layers, div_layer_value,
                output_size):
    """Deterministic parameter init mirroring the PyTorch module's shapes."""
    k_kw, key = jax.random.split(key)
    kw = jax.random.normal(k_kw, (hidden_size, input_size), jnp.float32)
    kw = kw / jnp.linalg.norm(kw, axis=1, keepdims=True)  # F.normalize(p=2, dim=1)

    mlp_params = []
    in_size = hidden_size
    for _ in range(hidden_layers):
        new_size = max(1, in_size // div_layer_value)
        kw_key, kb_key, key = jax.random.split(key, 3)
        bound = 1.0 / (in_size ** 0.5)
        W = jax.random.uniform(kw_key, (new_size, in_size), jnp.float32, -bound, bound)
        b = jax.random.uniform(kb_key, (new_size,), jnp.float32, -bound, bound)
        mlp_params.append((W, b))
        in_size = new_size
    kw_key, kb_key, key = jax.random.split(key, 3)
    bound = 1.0 / (in_size ** 0.5)
    W = jax.random.uniform(kw_key, (output_size, in_size), jnp.float32, -bound, bound)
    b = jax.random.uniform(kb_key, (output_size,), jnp.float32, -bound, bound)
    mlp_params.append((W, b))
    return kw, mlp_params


if __name__ == "__main__":
    # Small config consistent with the module's forward (image -> flatten).
    B, C, Himg, Wimg = 2, 4, 16, 16
    input_size = C * Himg * Wimg          # 1024
    hidden_size = 32
    hidden_layers = 2
    div_layer_value = 2
    output_size = 10
    temperature = 0.5

    key = jax.random.PRNGKey(0)
    k_x, k_params = jax.random.split(key)
    x = jax.random.normal(k_x, (B, C, Himg, Wimg), jnp.float32)

    kohonen_weights, mlp_params = init_params(
        k_params, input_size, hidden_size, hidden_layers, div_layer_value,
        output_size)

    out, winners, batch_size = cpnn_forward(x, kohonen_weights, mlp_params,
                                            temperature)
    jax.block_until_ready((out, winners))

    ref_out, ref_winners = cpnn_reference(x, kohonen_weights, mlp_params,
                                          temperature)

    assert out.shape == (B, output_size)
    assert winners.shape == (B,)
    assert batch_size == B
    assert bool(jnp.array_equal(winners, ref_winners))
    assert bool(jnp.allclose(out, ref_out, atol=2e-2, rtol=2e-2))
    print("KERNEL_OK")
</pallas_src>

<mosaic_0001>
module attributes {stable_mosaic.version = 11 : i64} {
  func.func @_cpnn_forward_kernel(%arg0: i32, %arg1: i32, %arg2: memref<16x1024xf32, #tpu.memory_space<vmem>>, %arg3: memref<1024x128xbf16, #tpu.memory_space<vmem>>, %arg4: memref<16x1xf32, #tpu.memory_space<vmem>>, %arg5: memref<1x128xf32, #tpu.memory_space<vmem>>, %arg6: memref<128x128xf32, #tpu.memory_space<vmem>>, %arg7: memref<1x128xf32, #tpu.memory_space<vmem>>, %arg8: memref<128x128xf32, #tpu.memory_space<vmem>>, %arg9: memref<1x128xf32, #tpu.memory_space<vmem>>, %arg10: memref<128x128xf32, #tpu.memory_space<vmem>>, %arg11: memref<1x128xf32, #tpu.memory_space<vmem>>, %arg12: memref<16x128xf32, #tpu.memory_space<vmem>>, %arg13: memref<16x128xi32, #tpu.memory_space<vmem>>, %arg14: memref<16x128xf32, #tpu.memory_space<vmem>>) attributes {dimension_semantics = [#tpu.dimension_semantics<parallel>, #tpu.dimension_semantics<arbitrary>], iteration_bounds = array<i64: 1, 1>, scalar_prefetch = 0 : i64, scratch_operands = 1 : i64, tpu.core_type = #tpu.core_type<tc>, window_params = [{transform_indices = @transform_0, window_bounds = array<i64: 16, 1024>}, {pipeline_mode = #tpu.pipeline_mode<synchronous>, transform_indices = @transform_1, window_bounds = array<i64: 1024, 128>}, {transform_indices = @transform_2, window_bounds = array<i64: 16, 1>}, {pipeline_mode = #tpu.pipeline_mode<synchronous>, transform_indices = @transform_3, window_bounds = array<i64: 1, 128>}, {pipeline_mode = #tpu.pipeline_mode<synchronous>, transform_indices = @transform_4, window_bounds = array<i64: 128, 128>}, {pipeline_mode = #tpu.pipeline_mode<synchronous>, transform_indices = @transform_5, window_bounds = array<i64: 1, 128>}, {pipeline_mode = #tpu.pipeline_mode<synchronous>, transform_indices = @transform_6, window_bounds = array<i64: 128, 128>}, {pipeline_mode = #tpu.pipeline_mode<synchronous>, transform_indices = @transform_7, window_bounds = array<i64: 1, 128>}, {pipeline_mode = #tpu.pipeline_mode<synchronous>, transform_indices = @transform_8, window_bounds = array<i64: 128, 128>}, {pipeline_mode = #tpu.pipeline_mode<synchronous>, transform_indices = @transform_9, window_bounds = array<i64: 1, 128>}, {transform_indices = @transform_10, window_bounds = array<i64: 16, 128>}, {transform_indices = @transform_11, window_bounds = array<i64: 16, 128>}]} {
    %c0_i32 = arith.constant 0 : i32
    %0 = arith.cmpi eq, %arg1, %c0_i32 : i32
    %1 = arith.extui %0 : i1 to i32
    %c0_i32_0 = arith.constant 0 : i32
    %2 = arith.cmpi ne, %1, %c0_i32_0 : i32
    scf.if %2 {
      %cst_9 = arith.constant 0.000000e+00 : f32
      %16 = vector.broadcast %cst_9 : f32 to vector<16x128xf32>
      %c0_10 = arith.constant 0 : index
      %c0_11 = arith.constant 0 : index
      %17 = vector.load %arg14[%c0_10, %c0_11] : memref<16x128xf32, #tpu.memory_space<vmem>>, vector<16x128xf32>
      tpu.vector_store %arg14[%c0_10, %c0_11], %16 {strides = array<i32>} : memref<16x128xf32, #tpu.memory_space<vmem>>, vector<16x128xf32>,
    } else {
    }
    %c0 = arith.constant 0 : index
    %c0_1 = arith.constant 0 : index
    %3 = vector.load %arg2[%c0, %c0_1] : memref<16x1024xf32, #tpu.memory_space<vmem>>, vector<16x1024xf32>
    %4 = arith.truncf %3 : vector<16x1024xf32> to vector<16x1024xbf16>
    %c1024_i32 = arith.constant 1024 : i32
    %5 = arith.muli %arg1, %c1024_i32 : i32
    %6 = tpu.assume_multiple %5, 128 : i32
    %7 = arith.index_cast %6 : i32 to index
    %c0_2 = arith.constant 0 : index
    %8 = vector.load %arg3[%7, %c0_2] : memref<1024x128xbf16, #tpu.memory_space<vmem>>, vector<1024x128xbf16>
    %c0_3 = arith.constant 0 : index
    %c0_4 = arith.constant 0 : index
    %9 = vector.load %arg14[%c0_3, %c0_4] : memref<16x128xf32, #tpu.memory_space<vmem>>, vector<16x128xf32>
    %cst = arith.constant dense<0.000000e+00> : vector<16x128xf32>
    %10 = tpu.matmul %4, %8, %cst {dimension_numbers = #tpu.dot_dimension_numbers<[1], [0], [0], [1], [0, 0, 1, 1], [], []>} : vector<16x1024xbf16>, vector<1024x128xbf16>, vector<16x128xf32> -> vector<16x128xf32>
    %11 = arith.addf %9, %10 : vector<16x128xf32>
    %c0_5 = arith.constant 0 : index
    %c0_6 = arith.constant 0 : index
    %12 = vector.load %arg14[%c0_5, %c0_6] : memref<16x128xf32, #tpu.memory_space<vmem>>, vector<16x128xf32>
    tpu.vector_store %arg14[%c0_5, %c0_6], %11 {strides = array<i32>} : memref<16x128xf32, #tpu.memory_space<vmem>>, vector<16x128xf32>,
    %c0_i32_7 = arith.constant 0 : i32
    %13 = arith.cmpi eq, %arg1, %c0_i32_7 : i32
    %14 = arith.extui %13 : i1 to i32
    %c0_i32_8 = arith.constant 0 : i32
    %15 = arith.cmpi ne, %14, %c0_i32_8 : i32
    scf.if %15 {
      %c0_9 = arith.constant 0 : index
      %c0_10 = arith.constant 0 : index
      %16 = vector.load %arg4[%c0_9, %c0_10] : memref<16x1xf32, #tpu.memory_space<vmem>>, vector<16x1xf32>
      %c0_11 = arith.constant 0 : index
      %c0_12 = arith.constant 0 : index
      %17 = vector.load %arg5[%c0_11, %c0_12] : memref<1x128xf32, #tpu.memory_space<vmem>>, vector<1x128xf32>
      %c0_13 = arith.constant 0 : index
      %c0_14 = arith.constant 0 : index
      %18 = vector.load %arg14[%c0_13, %c0_14] : memref<16x128xf32, #tpu.memory_space<vmem>>, vector<16x128xf32>
      %19 = vector.broadcast %16 : vector<16x1xf32> to vector<16x128xf32>
      %20 = vector.broadcast %17 : vector<1x128xf32> to vector<16x128xf32>
      %21 = arith.addf %19, %20 : vector<16x128xf32>
      %cst_15 = arith.constant 2.000000e+00 : f32
      %22 = vector.broadcast %cst_15 : f32 to vector<16x128xf32>
      %23 = arith.mulf %22, %18 : vector<16x128xf32>
      %24 = arith.subf %21, %23 : vector<16x128xf32>
      %cst_16 = arith.constant 0.000000e+00 : f32
      %25 = vector.broadcast %cst_16 : f32 to vector<16x128xf32>
      %26 = arith.maximumf %24, %25 : vector<16x128xf32>
      %27 = tpu.iota {dimensions = array<i32: 1>} : vector<16x128xi32>
      %c32_i32 = arith.constant 32 : i32
      %28 = vector.broadcast %c32_i32 : i32 to vector<16x128xi32>
      %29 = arith.cmpi slt, %27, %28 : vector<16x128xi32>
      %cst_17 = arith.constant 3.000000e+38 : f32
      %30 = vector.broadcast %cst_17 : f32 to vector<16x128xf32>
      %31 = arith.select %29, %26, %30 : vector<16x128xi1>, vector<16x128xf32>
      %cst_18 = arith.constant dense<0x7F800000> : vector<16xf32>
      %32 = vector.multi_reduction <minimumf>, %31, %cst_18 [1] : vector<16x128xf32> to vector<16xf32>
      %33 = vector.shape_cast %32 : vector<16xf32> to vector<16x1xf32>
      %34 = vector.broadcast %33 : vector<16x1xf32> to vector<16x128xf32>
      %35 = arith.cmpf oeq, %31, %34 : vector<16x128xf32>
      %c128_i32 = arith.constant 128 : i32
      %36 = vector.broadcast %c128_i32 : i32 to vector<16x128xi32>
      %37 = arith.select %35, %27, %36 : vector<16x128xi1>, vector<16x128xi32>
      %cst_19 = arith.constant dense<2147483647> : vector<16xi32>
      %38 = vector.multi_reduction <minsi>, %37, %cst_19 [1] : vector<16x128xi32> to vector<16xi32>
      %39 = vector.shape_cast %38 : vector<16xi32> to vector<16x1xi32>
      %40 = vector.shape_cast %39 : vector<16x1xi32> to vector<16x1xi32>
      %41 = vector.broadcast %40 : vector<16x1xi32> to vector<16x128xi32>
      %c0_20 = arith.constant 0 : index
      %c0_21 = arith.constant 0 : index
      %42 = vector.load %arg13[%c0_20, %c0_21] : memref<16x128xi32, #tpu.memory_space<vmem>>, vector<16x128xi32>
      tpu.vector_store %arg13[%c0_20, %c0_21], %41 {strides = array<i32>} : memref<16x128xi32, #tpu.memory_space<vmem>>, vector<16x128xi32>,
      %43 = math.sqrt %26 : vector<16x128xf32>
      %cst_22 = arith.constant -2.000000e+00 : f32
      %44 = vector.broadcast %cst_22 : f32 to vector<16x128xf32>
      %45 = arith.mulf %43, %44 : vector<16x128xf32>
      %cst_23 = arith.constant -1.000000e+30 : f32
      %46 = vector.broadcast %cst_23 : f32 to vector<16x128xf32>
      %47 = arith.select %29, %45, %46 : vector<16x128xi1>, vector<16x128xf32>
      %cst_24 = arith.constant dense<0xFF800000> : vector<16xf32>
      %48 = vector.multi_reduction <maximumf>, %47, %cst_24 [1] : vector<16x128xf32> to vector<16xf32>
      %49 = vector.shape_cast %48 : vector<16xf32> to vector<16x1xf32>
      %50 = vector.broadcast %49 : vector<16x1xf32> to vector<16x128xf32>
      %51 = arith.subf %47, %50 : vector<16x128xf32>
      %52 = math.exp %51 : vector<16x128xf32>
      %cst_25 = arith.constant dense<0.000000e+00> : vector<16xf32>
      %53 = vector.multi_reduction <add>, %52, %cst_25 [1] : vector<16x128xf32> to vector<16xf32>
      %54 = vector.shape_cast %53 : vector<16xf32> to vector<16x1xf32>
      %55 = tpu.reciprocal %54 {approx = true} : vector<16x1xf32> -> vector<16x1xf32>
      %56 = vector.broadcast %55 : vector<16x1xf32> to vector<16x128xf32>
      %57 = arith.mulf %52, %56 : vector<16x128xf32>
      %c0_26 = arith.constant 0 : index
      %c0_27 = arith.constant 0 : index
      %58 = vector.load %arg6[%c0_26, %c0_27] : memref<128x128xf32, #tpu.memory_space<vmem>>, vector<128x128xf32>
      %c0_28 = arith.constant 0 : index
      %c0_29 = arith.constant 0 : index
      %59 = vector.load %arg7[%c0_28, %c0_29] : memref<1x128xf32, #tpu.memory_space<vmem>>, vector<1x128xf32>
      %cst_30 = arith.constant dense<0.000000e+00> : vector<16x128xf32>
      %60 = tpu.matmul %57, %58, %cst_30 {dimension_numbers = #tpu.dot_dimension_numbers<[1], [0], [0], [1], [0, 0, 1, 1], [], []>} : vector<16x128xf32>, vector<128x128xf32>, vector<16x128xf32> -> vector<16x128xf32>
      %61 = vector.broadcast %59 : vector<1x128xf32> to vector<16x128xf32>
      %62 = arith.addf %60, %61 : vector<16x128xf32>
      %cst_31 = arith.constant 0.000000e+00 : f32
      %63 = vector.broadcast %cst_31 : f32 to vector<16x128xf32>
      %64 = arith.maximumf %62, %63 : vector<16x128xf32>
      %c0_32 = arith.constant 0 : index
      %c0_33 = arith.constant 0 : index
      %65 = vector.load %arg8[%c0_32, %c0_33] : memref<128x128xf32, #tpu.memory_space<vmem>>, vector<128x128xf32>
      %c0_34 = arith.constant 0 : index
      %c0_35 = arith.constant 0 : index
      %66 = vector.load %arg9[%c0_34, %c0_35] : memref<1x128xf32, #tpu.memory_space<vmem>>, vector<1x128xf32>
      %cst_36 = arith.constant dense<0.000000e+00> : vector<16x128xf32>
      %67 = tpu.matmul %64, %65, %cst_36 {dimension_numbers = #tpu.dot_dimension_numbers<[1], [0], [0], [1], [0, 0, 1, 1], [], []>} : vector<16x128xf32>, vector<128x128xf32>, vector<16x128xf32> -> vector<16x128xf32>
      %68 = vector.broadcast %66 : vector<1x128xf32> to vector<16x128xf32>
      %69 = arith.addf %67, %68 : vector<16x128xf32>
      %cst_37 = arith.constant 0.000000e+00 : f32
      %70 = vector.broadcast %cst_37 : f32 to vector<16x128xf32>
      %71 = arith.maximumf %69, %70 : vector<16x128xf32>
      %c0_38 = arith.constant 0 : index
      %c0_39 = arith.constant 0 : index
      %72 = vector.load %arg10[%c0_38, %c0_39] : memref<128x128xf32, #tpu.memory_space<vmem>>, vector<128x128xf32>
      %c0_40 = arith.constant 0 : index
      %c0_41 = arith.constant 0 : index
      %73 = vector.load %arg11[%c0_40, %c0_41] : memref<1x128xf32, #tpu.memory_space<vmem>>, vector<1x128xf32>
      %cst_42 = arith.constant dense<0.000000e+00> : vector<16x128xf32>
      %74 = tpu.matmul %71, %72, %cst_42 {dimension_numbers = #tpu.dot_dimension_numbers<[1], [0], [0], [1], [0, 0, 1, 1], [], []>} : vector<16x128xf32>, vector<128x128xf32>, vector<16x128xf32> -> vector<16x128xf32>
      %75 = vector.broadcast %73 : vector<1x128xf32> to vector<16x128xf32>
      %76 = arith.addf %74, %75 : vector<16x128xf32>
      %c0_43 = arith.constant 0 : index
      %c0_44 = arith.constant 0 : index
      %77 = vector.load %arg12[%c0_43, %c0_44] : memref<16x128xf32, #tpu.memory_space<vmem>>, vector<16x128xf32>
      tpu.vector_store %arg12[%c0_43, %c0_44], %76 {strides = array<i32>} : memref<16x128xf32, #tpu.memory_space<vmem>>, vector<16x128xf32>,
    } else {
    }
    return
  }
  func.func @transform_0(%arg0: i32, %arg1: i32) -> (i32, i32) {
    %c0_i32 = arith.constant 0 : i32
    return %arg0, %arg1 : i32, i32
  }
  func.func @transform_1(%arg0: i32, %arg1: i32) -> (i32, i32) {
    %c0_i32 = arith.constant 0 : i32
    %c0_i32_0 = arith.constant 0 : i32
    %c0_i32_1 = arith.constant 0 : i32
    return %c0_i32, %c0_i32_0 : i32, i32
  }
  func.func @transform_2(%arg0: i32, %arg1: i32) -> (i32, i32) {
    %c0_i32 = arith.constant 0 : i32
    %c0_i32_0 = arith.constant 0 : i32
    return %arg0, %c0_i32 : i32, i32
  }
  func.func @transform_3(%arg0: i32, %arg1: i32) -> (i32, i32) {
    %c0_i32 = arith.constant 0 : i32
    %c0_i32_0 = arith.constant 0 : i32
    %c0_i32_1 = arith.constant 0 : i32
    return %c0_i32, %c0_i32_0 : i32, i32
  }
  func.func @transform_4(%arg0: i32, %arg1: i32) -> (i32, i32) {
    %c0_i32 = arith.constant 0 : i32
    %c0_i32_0 = arith.constant 0 : i32
    %c0_i32_1 = arith.constant 0 : i32
    return %c0_i32, %c0_i32_0 : i32, i32
  }
  func.func @transform_5(%arg0: i32, %arg1: i32) -> (i32, i32) {
    %c0_i32 = arith.constant 0 : i32
    %c0_i32_0 = arith.constant 0 : i32
    %c0_i32_1 = arith.constant 0 : i32
    return %c0_i32, %c0_i32_0 : i32, i32
  }
  func.func @transform_6(%arg0: i32, %arg1: i32) -> (i32, i32) {
    %c0_i32 = arith.constant 0 : i32
    %c0_i32_0 = arith.constant 0 : i32
    %c0_i32_1 = arith.constant 0 : i32
    return %c0_i32, %c0_i32_0 : i32, i32
  }
  func.func @transform_7(%arg0: i32, %arg1: i32) -> (i32, i32) {
    %c0_i32 = arith.constant 0 : i32
    %c0_i32_0 = arith.constant 0 : i32
    %c0_i32_1 = arith.constant 0 : i32
    return %c0_i32, %c0_i32_0 : i32, i32
  }
  func.func @transform_8(%arg0: i32, %arg1: i32) -> (i32, i32) {
    %c0_i32 = arith.constant 0 : i32
    %c0_i32_0 = arith.constant 0 : i32
    %c0_i32_1 = arith.constant 0 : i32
    return %c0_i32, %c0_i32_0 : i32, i32
  }
  func.func @transform_9(%arg0: i32, %arg1: i32) -> (i32, i32) {
    %c0_i32 = arith.constant 0 : i32
    %c0_i32_0 = arith.constant 0 : i32
    %c0_i32_1 = arith.constant 0 : i32
    return %c0_i32, %c0_i32_0 : i32, i32
  }
  func.func @transform_10(%arg0: i32, %arg1: i32) -> (i32, i32) {
    %c0_i32 = arith.constant 0 : i32
    %c0_i32_0 = arith.constant 0 : i32
    return %arg0, %c0_i32 : i32, i32
  }
  func.func @transform_11(%arg0: i32, %arg1: i32) -> (i32, i32) {
    %c0_i32 = arith.constant 0 : i32
    %c0_i32_0 = arith.constant 0 : i32
    return %arg0, %c0_i32 : i32, i32
  }
}

module attributes {stable_mosaic.version = 11 : i64} {
  func.func @_cpnn_forward_kernel(%arg0: i32, %arg1: i32, %arg2: memref<16x1024xf32, #tpu.memory_space<vmem>>, %arg3: memref<1024x128xbf16, #tpu.memory_space<vmem>>, %arg4: memref<16x1xf32, #tpu.memory_space<vmem>>, %arg5: memref<1x128xf32, #tpu.memory_space<vmem>>, %arg6: memref<128x128xf32, #tpu.memory_space<vmem>>, %arg7: memref<1x128xf32, #tpu.memory_space<vmem>>, %arg8: memref<128x128xf32, #tpu.memory_space<vmem>>, %arg9: memref<1x128xf32, #tpu.memory_space<vmem>>, %arg10: memref<128x128xf32, #tpu.memory_space<vmem>>, %arg11: memref<1x128xf32, #tpu.memory_space<vmem>>, %arg12: memref<16x128xf32, #tpu.memory_space<vmem>>, %arg13: memref<16x128xi32, #tpu.memory_space<vmem>>, %arg14: memref<16x128xf32, #tpu.memory_space<vmem>>) attributes {dimension_semantics = [#tpu.dimension_semantics<parallel>, #tpu.dimension_semantics<arbitrary>], iteration_bounds = array<i64: 1, 1>, scalar_prefetch = 0 : i64, scratch_operands = 1 : i64, tpu.core_type = #tpu.core_type<tc>, window_params = [{transform_indices = @transform_0, window_bounds = array<i64: 16, 1024>}, {pipeline_mode = #tpu.pipeline_mode<synchronous>, transform_indices = @transform_1, window_bounds = array<i64: 1024, 128>}, {transform_indices = @transform_2, window_bounds = array<i64: 16, 1>}, {pipeline_mode = #tpu.pipeline_mode<synchronous>, transform_indices = @transform_3, window_bounds = array<i64: 1, 128>}, {pipeline_mode = #tpu.pipeline_mode<synchronous>, transform_indices = @transform_4, window_bounds = array<i64: 128, 128>}, {pipeline_mode = #tpu.pipeline_mode<synchronous>, transform_indices = @transform_5, window_bounds = array<i64: 1, 128>}, {pipeline_mode = #tpu.pipeline_mode<synchronous>, transform_indices = @transform_6, window_bounds = array<i64: 128, 128>}, {pipeline_mode = #tpu.pipeline_mode<synchronous>, transform_indices = @transform_7, window_bounds = array<i64: 1, 128>}, {pipeline_mode = #tpu.pipeline_mode<synchronous>, transform_indices = @transform_8, window_bounds = array<i64: 128, 128>}, {pipeline_mode = #tpu.pipeline_mode<synchronous>, transform_indices = @transform_9, window_bounds = array<i64: 1, 128>}, {transform_indices = @transform_10, window_bounds = array<i64: 16, 128>}, {transform_indices = @transform_11, window_bounds = array<i64: 16, 128>}]} {
    %c0_i32 = arith.constant 0 : i32
    %0 = arith.cmpi eq, %arg1, %c0_i32 : i32
    %1 = arith.extui %0 : i1 to i32
    %c0_i32_0 = arith.constant 0 : i32
    %2 = arith.cmpi ne, %1, %c0_i32_0 : i32
    scf.if %2 {
      %cst_9 = arith.constant 0.000000e+00 : f32
      %16 = vector.broadcast %cst_9 : f32 to vector<16x128xf32>
      %c0_10 = arith.constant 0 : index
      %c0_11 = arith.constant 0 : index
      %17 = vector.load %arg14[%c0_10, %c0_11] : memref<16x128xf32, #tpu.memory_space<vmem>>, vector<16x128xf32>
      tpu.vector_store %arg14[%c0_10, %c0_11], %16 {strides = array<i32>} : memref<16x128xf32, #tpu.memory_space<vmem>>, vector<16x128xf32>,
    } else {
    }
    %c0 = arith.constant 0 : index
    %c0_1 = arith.constant 0 : index
    %3 = vector.load %arg2[%c0, %c0_1] : memref<16x1024xf32, #tpu.memory_space<vmem>>, vector<16x1024xf32>
    %4 = arith.truncf %3 : vector<16x1024xf32> to vector<16x1024xbf16>
    %c1024_i32 = arith.constant 1024 : i32
    %5 = arith.muli %arg1, %c1024_i32 : i32
    %6 = tpu.assume_multiple %5, 128 : i32
    %7 = arith.index_cast %6 : i32 to index
    %c0_2 = arith.constant 0 : index
    %8 = vector.load %arg3[%7, %c0_2] : memref<1024x128xbf16, #tpu.memory_space<vmem>>, vector<1024x128xbf16>
    %c0_3 = arith.constant 0 : index
    %c0_4 = arith.constant 0 : index
    %9 = vector.load %arg14[%c0_3, %c0_4] : memref<16x128xf32, #tpu.memory_space<vmem>>, vector<16x128xf32>
    %cst = arith.constant dense<0.000000e+00> : vector<16x128xf32>
    %10 = tpu.matmul %4, %8, %cst {dimension_numbers = #tpu.dot_dimension_numbers<[1], [0], [0], [1], [0, 0, 1, 1], [], []>} : vector<16x1024xbf16>, vector<1024x128xbf16>, vector<16x128xf32> -> vector<16x128xf32>
    %11 = arith.addf %9, %10 : vector<16x128xf32>
    %c0_5 = arith.constant 0 : index
    %c0_6 = arith.constant 0 : index
    %12 = vector.load %arg14[%c0_5, %c0_6] : memref<16x128xf32, #tpu.memory_space<vmem>>, vector<16x128xf32>
    tpu.vector_store %arg14[%c0_5, %c0_6], %11 {strides = array<i32>} : memref<16x128xf32, #tpu.memory_space<vmem>>, vector<16x128xf32>,
    %c0_i32_7 = arith.constant 0 : i32
    %13 = arith.cmpi eq, %arg1, %c0_i32_7 : i32
    %14 = arith.extui %13 : i1 to i32
    %c0_i32_8 = arith.constant 0 : i32
    %15 = arith.cmpi ne, %14, %c0_i32_8 : i32
    scf.if %15 {
      %c0_9 = arith.constant 0 : index
      %c0_10 = arith.constant 0 : index
      %16 = vector.load %arg4[%c0_9, %c0_10] : memref<16x1xf32, #tpu.memory_space<vmem>>, vector<16x1xf32>
      %c0_11 = arith.constant 0 : index
      %c0_12 = arith.constant 0 : index
      %17 = vector.load %arg5[%c0_11, %c0_12] : memref<1x128xf32, #tpu.memory_space<vmem>>, vector<1x128xf32>
      %c0_13 = arith.constant 0 : index
      %c0_14 = arith.constant 0 : index
      %18 = vector.load %arg14[%c0_13, %c0_14] : memref<16x128xf32, #tpu.memory_space<vmem>>, vector<16x128xf32>
      %19 = vector.broadcast %16 : vector<16x1xf32> to vector<16x128xf32>
      %20 = vector.broadcast %17 : vector<1x128xf32> to vector<16x128xf32>
      %21 = arith.addf %19, %20 : vector<16x128xf32>
      %cst_15 = arith.constant 2.000000e+00 : f32
      %22 = vector.broadcast %cst_15 : f32 to vector<16x128xf32>
      %23 = arith.mulf %22, %18 : vector<16x128xf32>
      %24 = arith.subf %21, %23 : vector<16x128xf32>
      %cst_16 = arith.constant 0.000000e+00 : f32
      %25 = vector.broadcast %cst_16 : f32 to vector<16x128xf32>
      %26 = arith.maximumf %24, %25 : vector<16x128xf32>
      %27 = tpu.iota {dimensions = array<i32: 1>} : vector<16x128xi32>
      %c32_i32 = arith.constant 32 : i32
      %28 = vector.broadcast %c32_i32 : i32 to vector<16x128xi32>
      %29 = arith.cmpi slt, %27, %28 : vector<16x128xi32>
      %cst_17 = arith.constant 3.000000e+38 : f32
      %30 = vector.broadcast %cst_17 : f32 to vector<16x128xf32>
      %31 = arith.select %29, %26, %30 : vector<16x128xi1>, vector<16x128xf32>
      %cst_18 = arith.constant dense<0x7F800000> : vector<16xf32>
      %32 = vector.multi_reduction <minimumf>, %31, %cst_18 [1] : vector<16x128xf32> to vector<16xf32>
      %33 = vector.shape_cast %32 : vector<16xf32> to vector<16x1xf32>
      %34 = vector.broadcast %33 : vector<16x1xf32> to vector<16x128xf32>
      %35 = arith.cmpf oeq, %31, %34 : vector<16x128xf32>
      %c128_i32 = arith.constant 128 : i32
      %36 = vector.broadcast %c128_i32 : i32 to vector<16x128xi32>
      %37 = arith.select %35, %27, %36 : vector<16x128xi1>, vector<16x128xi32>
      %cst_19 = arith.constant dense<2147483647> : vector<16xi32>
      %38 = vector.multi_reduction <minsi>, %37, %cst_19 [1] : vector<16x128xi32> to vector<16xi32>
      %39 = vector.shape_cast %38 : vector<16xi32> to vector<16x1xi32>
      %40 = vector.shape_cast %39 : vector<16x1xi32> to vector<16x1xi32>
      %41 = vector.broadcast %40 : vector<16x1xi32> to vector<16x128xi32>
      %c0_20 = arith.constant 0 : index
      %c0_21 = arith.constant 0 : index
      %42 = vector.load %arg13[%c0_20, %c0_21] : memref<16x128xi32, #tpu.memory_space<vmem>>, vector<16x128xi32>
      tpu.vector_store %arg13[%c0_20, %c0_21], %41 {strides = array<i32>} : memref<16x128xi32, #tpu.memory_space<vmem>>, vector<16x128xi32>,
      %43 = math.sqrt %26 : vector<16x128xf32>
      %cst_22 = arith.constant -2.000000e+00 : f32
      %44 = vector.broadcast %cst_22 : f32 to vector<16x128xf32>
      %45 = arith.mulf %43, %44 : vector<16x128xf32>
      %cst_23 = arith.constant -1.000000e+30 : f32
      %46 = vector.broadcast %cst_23 : f32 to vector<16x128xf32>
      %47 = arith.select %29, %45, %46 : vector<16x128xi1>, vector<16x128xf32>
      %cst_24 = arith.constant dense<0xFF800000> : vector<16xf32>
      %48 = vector.multi_reduction <maximumf>, %47, %cst_24 [1] : vector<16x128xf32> to vector<16xf32>
      %49 = vector.shape_cast %48 : vector<16xf32> to vector<16x1xf32>
      %50 = vector.broadcast %49 : vector<16x1xf32> to vector<16x128xf32>
      %51 = arith.subf %47, %50 : vector<16x128xf32>
      %52 = math.exp %51 : vector<16x128xf32>
      %cst_25 = arith.constant dense<0.000000e+00> : vector<16xf32>
      %53 = vector.multi_reduction <add>, %52, %cst_25 [1] : vector<16x128xf32> to vector<16xf32>
      %54 = vector.shape_cast %53 : vector<16xf32> to vector<16x1xf32>
      %55 = tpu.reciprocal %54 {approx = true} : vector<16x1xf32> -> vector<16x1xf32>
      %56 = vector.broadcast %55 : vector<16x1xf32> to vector<16x128xf32>
      %57 = arith.mulf %52, %56 : vector<16x128xf32>
      %c0_26 = arith.constant 0 : index
      %c0_27 = arith.constant 0 : index
      %58 = vector.load %arg6[%c0_26, %c0_27] : memref<128x128xf32, #tpu.memory_space<vmem>>, vector<128x128xf32>
      %c0_28 = arith.constant 0 : index
      %c0_29 = arith.constant 0 : index
      %59 = vector.load %arg7[%c0_28, %c0_29] : memref<1x128xf32, #tpu.memory_space<vmem>>, vector<1x128xf32>
      %cst_30 = arith.constant dense<0.000000e+00> : vector<16x128xf32>
      %60 = tpu.matmul %57, %58, %cst_30 {dimension_numbers = #tpu.dot_dimension_numbers<[1], [0], [0], [1], [0, 0, 1, 1], [], []>} : vector<16x128xf32>, vector<128x128xf32>, vector<16x128xf32> -> vector<16x128xf32>
      %61 = vector.broadcast %59 : vector<1x128xf32> to vector<16x128xf32>
      %62 = arith.addf %60, %61 : vector<16x128xf32>
      %cst_31 = arith.constant 0.000000e+00 : f32
      %63 = vector.broadcast %cst_31 : f32 to vector<16x128xf32>
      %64 = arith.maximumf %62, %63 : vector<16x128xf32>
      %c0_32 = arith.constant 0 : index
      %c0_33 = arith.constant 0 : index
      %65 = vector.load %arg8[%c0_32, %c0_33] : memref<128x128xf32, #tpu.memory_space<vmem>>, vector<128x128xf32>
      %c0_34 = arith.constant 0 : index
      %c0_35 = arith.constant 0 : index
      %66 = vector.load %arg9[%c0_34, %c0_35] : memref<1x128xf32, #tpu.memory_space<vmem>>, vector<1x128xf32>
      %cst_36 = arith.constant dense<0.000000e+00> : vector<16x128xf32>
      %67 = tpu.matmul %64, %65, %cst_36 {dimension_numbers = #tpu.dot_dimension_numbers<[1], [0], [0], [1], [0, 0, 1, 1], [], []>} : vector<16x128xf32>, vector<128x128xf32>, vector<16x128xf32> -> vector<16x128xf32>
      %68 = vector.broadcast %66 : vector<1x128xf32> to vector<16x128xf32>
      %69 = arith.addf %67, %68 : vector<16x128xf32>
      %cst_37 = arith.constant 0.000000e+00 : f32
      %70 = vector.broadcast %cst_37 : f32 to vector<16x128xf32>
      %71 = arith.maximumf %69, %70 : vector<16x128xf32>
      %c0_38 = arith.constant 0 : index
      %c0_39 = arith.constant 0 : index
      %72 = vector.load %arg10[%c0_38, %c0_39] : memref<128x128xf32, #tpu.memory_space<vmem>>, vector<128x128xf32>
      %c0_40 = arith.constant 0 : index
      %c0_41 = arith.constant 0 : index
      %73 = vector.load %arg11[%c0_40, %c0_41] : memref<1x128xf32, #tpu.memory_space<vmem>>, vector<1x128xf32>
      %cst_42 = arith.constant dense<0.000000e+00> : vector<16x128xf32>
      %74 = tpu.matmul %71, %72, %cst_42 {dimension_numbers = #tpu.dot_dimension_numbers<[1], [0], [0], [1], [0, 0, 1, 1], [], []>} : vector<16x128xf32>, vector<128x128xf32>, vector<16x128xf32> -> vector<16x128xf32>
      %75 = vector.broadcast %73 : vector<1x128xf32> to vector<16x128xf32>
      %76 = arith.addf %74, %75 : vector<16x128xf32>
      %c0_43 = arith.constant 0 : index
      %c0_44 = arith.constant 0 : index
      %77 = vector.load %arg12[%c0_43, %c0_44] : memref<16x128xf32, #tpu.memory_space<vmem>>, vector<16x128xf32>
      tpu.vector_store %arg12[%c0_43, %c0_44], %76 {strides = array<i32>} : memref<16x128xf32, #tpu.memory_space<vmem>>, vector<16x128xf32>,
    } else {
    }
    return
  }
  func.func @transform_0(%arg0: i32, %arg1: i32) -> (i32, i32) {
    %c0_i32 = arith.constant 0 : i32
    return %arg0, %arg1 : i32, i32
  }
  func.func @transform_1(%arg0: i32, %arg1: i32) -> (i32, i32) {
    %c0_i32 = arith.constant 0 : i32
    %c0_i32_0 = arith.constant 0 : i32
    %c0_i32_1 = arith.constant 0 : i32
    return %c0_i32, %c0_i32_0 : i32, i32
  }
  func.func @transform_2(%arg0: i32, %arg1: i32) -> (i32, i32) {
    %c0_i32 = arith.constant 0 : i32
    %c0_i32_0 = arith.constant 0 : i32
    return %arg0, %c0_i32 : i32, i32
  }
  func.func @transform_3(%arg0: i32, %arg1: i32) -> (i32, i32) {
    %c0_i32 = arith.constant 0 : i32
    %c0_i32_0 = arith.constant 0 : i32
    %c0_i32_1 = arith.constant 0 : i32
    return %c0_i32, %c0_i32_0 : i32, i32
  }
  func.func @transform_4(%arg0: i32, %arg1: i32) -> (i32, i32) {
    %c0_i32 = arith.constant 0 : i32
    %c0_i32_0 = arith.constant 0 : i32
    %c0_i32_1 = arith.constant 0 : i32
    return %c0_i32, %c0_i32_0 : i32, i32
  }
  func.func @transform_5(%arg0: i32, %arg1: i32) -> (i32, i32) {
    %c0_i32 = arith.constant 0 : i32
    %c0_i32_0 = arith.constant 0 : i32
    %c0_i32_1 = arith.constant 0 : i32
    return %c0_i32, %c0_i32_0 : i32, i32
  }
  func.func @transform_6(%arg0: i32, %arg1: i32) -> (i32, i32) {
    %c0_i32 = arith.constant 0 : i32
    %c0_i32_0 = arith.constant 0 : i32
    %c0_i32_1 = arith.constant 0 : i32
    return %c0_i32, %c0_i32_0 : i32, i32
  }
  func.func @transform_7(%arg0: i32, %arg1: i32) -> (i32, i32) {
    %c0_i32 = arith.constant 0 : i32
    %c0_i32_0 = arith.constant 0 : i32
    %c0_i32_1 = arith.constant 0 : i32
    return %c0_i32, %c0_i32_0 : i32, i32
  }
  func.func @transform_8(%arg0: i32, %arg1: i32) -> (i32, i32) {
    %c0_i32 = arith.constant 0 : i32
    %c0_i32_0 = arith.constant 0 : i32
    %c0_i32_1 = arith.constant 0 : i32
    return %c0_i32, %c0_i32_0 : i32, i32
  }
  func.func @transform_9(%arg0: i32, %arg1: i32) -> (i32, i32) {
    %c0_i32 = arith.constant 0 : i32
    %c0_i32_0 = arith.constant 0 : i32
    %c0_i32_1 = arith.constant 0 : i32
    return %c0_i32, %c0_i32_0 : i32, i32
  }
  func.func @transform_10(%arg0: i32, %arg1: i32) -> (i32, i32) {
    %c0_i32 = arith.constant 0 : i32
    %c0_i32_0 = arith.constant 0 : i32
    return %arg0, %c0_i32 : i32, i32
  }
  func.func @transform_11(%arg0: i32, %arg1: i32) -> (i32, i32) {
    %c0_i32 = arith.constant 0 : i32
    %c0_i32_0 = arith.constant 0 : i32
    return %arg0, %c0_i32 : i32, i32
  }
}

</mosaic_0001>

<bundles_post_ra>
// kernel: tpu_custom_call.1
= control target key start
LH: loop header
LB: loop body
LE: loop exit
PB: predicated region body
PF: predicated region fallthrough
CT: control target
= control target key end

     0   :  { %17 = vsyncpa [#allocation4], 0  ;;  %s1768_s0 = inlined_call_operand.hbm [shape: f32[16,1024], index: 0, kind: input, shape index: {}]   ;;  %s1769_s1 = inlined_call_operand.hbm [shape: bf16[1024,128], index: 1, kind: input, shape index: {}]   ;;  %s1770_s2 = inlined_call_operand.vmem [shape: f32[16,1], index: 2, kind: input, shape index: {}]   ;;  %s1771_s3 = inlined_call_operand.vmem [shape: f32[1,128], index: 3, kind: input, shape index: {}]   ;;  %s1772_s4 = inlined_call_operand.hbm [shape: f32[128,128], index: 4, kind: input, shape index: {}]   ;;  %s1773_s5 = inlined_call_operand.vmem [shape: f32[1,128], index: 5, kind: input, shape index: {}]   ;;  %s1774_s6 = inlined_call_operand.hbm [shape: f32[128,128], index: 6, kind: input, shape index: {}]   ;;  %s1775_s7 = inlined_call_operand.vmem [shape: f32[1,128], index: 7, kind: input, shape index: {}]   ;;  %s1776_s8 = inlined_call_operand.hbm [shape: f32[128,128], index: 8, kind: input, shape index: {}]   ;;  %s1777_s9 = inlined_call_operand.vmem [shape: f32[1,128], index: 9, kind: input, shape index: {}]   ;;  %s1778_s10 = inlined_call_operand.hbm [shape: f32[16,128], index: 10, kind: output, shape index: {0}]   ;;  %s1779_s11 = inlined_call_operand.hbm [shape: s32[16,128], index: 11, kind: output, shape index: {1}]  }
   0x1   :  { %18 = vsyncpa [#allocation7], 0 }
   0x2   :  { %19 = vsyncpa [#allocation10], 0 }
   0x3   :  { %20 = vsyncpa [#allocation5], 0  ;;  %s39_s19 = sshll.u32 %s1769_s1, 4  ;;  %s40_s19 = int_to_ptr.hbm [resolvable:$true] %s39_s19 }
   0x4   :  { %21 = vsyncpa [#allocation14], 0  ;;  %s1620_s20 = smov [#allocation6]   ;;  %s1621_s22 = smov 64  }
   0x5   :  { %s41_s21 = sshll.u32 %s1620_s20, 4  ;;  %s1622_s23 = smov 4   ;;  %s42_s21 = int_to_ptr.vmem [resolvable:$true] %s41_s21 }
   0x6   :  { %47 = dma.hbm_to_vmem [thread:$0]  %s40_s19, 8192, %s42_s21, [#allocation7], %s1621_s22, %s1621_s22, %s1622_s23  }
   0x7   :  { %s71_s26 = sshll.u32 %s1774_s6, 4  ;;  %s1623_s27 = smov [#allocation9]   ;;  %s72_s26 = int_to_ptr.hbm [resolvable:$true] %s71_s26 }
   0x8   :  { %s73_s28 = sshll.u32 %s1623_s27, 4  ;;  %s26_s12 = sshll.u32 %s1768_s0, 4  ;;  %s74_s28 = int_to_ptr.vmem [resolvable:$true] %s73_s28  ;;  %s27_s12 = int_to_ptr.hbm [resolvable:$true] %s26_s12 }
   0x9   :  { %s1624_s1 = smov 128   ;;  %s1625_s13 = smov 8  }
   0xa   :  { %79 = dma.hbm_to_vmem [thread:$0]  %s72_s26, 2048, %s74_s28, [#allocation10], %s1624_s1, %s1624_s1, %s1625_s13  }
   0xb   :  { %s1626_s14 = smov [#allocation3]   ;;  %s56_s6 = sshll.u32 %s1772_s4, 4  ;;  %s57_s6 = int_to_ptr.hbm [resolvable:$true] %s56_s6 }
   0xc   :  { %s28_s15 = sshll.u32 %s1626_s14, 4  ;;  %s1627_s18 = smov 1024   ;;  %s29_s15 = int_to_ptr.vmem [resolvable:$true] %s28_s15 }
   0xd   :  { %34 = dma.hbm_to_vmem [thread:$0]  %s27_s12, 2048, %s29_s15, [#allocation4], %s1627_s18, %s1627_s18, %s1621_s22  }
   0xe   :  { %s86_s20 = sshll.u32 %s1776_s8, 4  ;;  %s1628_s21 = smov [#allocation8]   ;;  %s87_s20 = int_to_ptr.hbm [resolvable:$true] %s86_s20 }
   0xf   :  { %s58_s23 = sshll.u32 %s1628_s21, 4  ;;  %s1629_s24 = smov [#allocation11]   ;;  %s59_s23 = int_to_ptr.vmem [resolvable:$true] %s58_s23 }
  0x10   :  { %64 = dma.hbm_to_vmem [thread:$0]  %s57_s6, 2048, %s59_s23, [#allocation7], %s1624_s1, %s1624_s1, %s1625_s13  }
  0x11   :  { %s88_s25 = sshll.u32 %s1629_s24, 4  ;;  %s89_s25 = int_to_ptr.vmem [resolvable:$true] %s88_s25 }
  0x12   :  { %94 = dma.hbm_to_vmem [thread:$0]  %s87_s20, 2048, %s89_s25, [#allocation10], %s1624_s1, %s1624_s1, %s1625_s13  }
  0x13   :  { %1610 = dma.done.wait [#allocation4], 2048  }
  0x14   :  { %1611 = vsyncadd [#allocation4], 4294965248 }
  0x15   :  { %1612 = dma.done.wait [#allocation7], 10240  }
  0x16   :  { %1613 = vsyncadd [#allocation7], 4294957056 }
  0x17   :  { %1614 = dma.done.wait [#allocation10], 4096  }
  0x18   :  { %1615 = vsyncadd [#allocation10], 4294963200  ;;  %v1339_v0 = vld [vmem:[#allocation6 + $0x38] sm:$0xff]  ;;  %v1338_v4 = vld [vmem:[#allocation6 + $0x30] sm:$0xff]  ;;  %v1630_v57 = vmov 0   ;;  %s1631_s30 = smov [#allocation13]  }
  0x19   :  { %v1347_v1 = vld [vmem:[#allocation6 + $0x78] sm:$0xff]  ;;  %666 = vmatpush.bf16.msra.mxu0 %v1339_v0  ;;  %v1346_v5 = vld [vmem:[#allocation6 + $0x70] sm:$0xff]  ;;  %v1337_v8 = vld [vmem:[#allocation6 + $0x28] sm:$0xff]  ;;  %1425 = vset.pattern.permute.xlu0 %v1630_v57  ;;  %s1052_s12 = sshll.u32 %s1631_s30, 4  ;;  %s1054_s16 = sshll.u32 %s1779_s11, 4  ;;  %s1053_s12 = int_to_ptr.vmem [resolvable:$true] %s1052_s12  ;;  %s1055_s16 = int_to_ptr.hbm [resolvable:$true] %s1054_s16 }
  0x1a   :  { %v1355_v2 = vld [vmem:[#allocation6 + $0xb8] sm:$0xff]  ;;  %680 = vmatpush.bf16.msra.mxu1 %v1347_v1  ;;  %v1354_v6 = vld [vmem:[#allocation6 + $0xb0] sm:$0xff]  ;;  %v1345_v9 = vld [vmem:[#allocation6 + $0x68] sm:$0xff]  ;;  %s1632_s6 = smov [#allocation12]   ;;  %s1041_s20 = sshll.u32 %s1778_s10, 4  ;;  %s1042_s20 = int_to_ptr.hbm [resolvable:$true] %s1041_s20 }
  0x1b   :  { %v1363_v3 = vld [vmem:[#allocation6 + $0xf8] sm:$0xff]  ;;  %694 = vmatpush.bf16.msra.mxu2 %v1355_v2  ;;  %v1362_v7 = vld [vmem:[#allocation6 + $0xf0] sm:$0xff]  ;;  %v1353_v10 = vld [vmem:[#allocation6 + $0xa8] sm:$0xff]  ;;  %s1039_s18 = sshll.u32 %s1632_s6, 4  ;;  %s1040_s18 = int_to_ptr.vmem [resolvable:$true] %s1039_s18 }
  0x1c   :  { %708 = vmatpush.bf16.msra.mxu3 %v1363_v3  ;;  %v1361_v11 = vld [vmem:[#allocation6 + $0xe8] sm:$0xff]  ;;  %v1336_v12 = vld [vmem:[#allocation6 + $0x20] sm:$0xff]  ;;  %v1335_v16 = vld [vmem:[#allocation6 + $0x18] sm:$0xff] }
  0x1d   :  { %667 = vmatpush.bf16.msra.mxu0 %v1338_v4  ;;  %v1344_v13 = vld [vmem:[#allocation6 + $0x60] sm:$0xff]  ;;  %v1343_v17 = vld [vmem:[#allocation6 + $0x58] sm:$0xff]  ;;  %v1334_v20 = vld [vmem:[#allocation6 + $0x10] sm:$0xff] }
  0x1e   :  { %681 = vmatpush.bf16.msra.mxu1 %v1346_v5  ;;  %v1352_v14 = vld [vmem:[#allocation6 + $0xa0] sm:$0xff]  ;;  %v1351_v18 = vld [vmem:[#allocation6 + $0x98] sm:$0xff]  ;;  %v1342_v21 = vld [vmem:[#allocation6 + $0x50] sm:$0xff] }
  0x1f   :  { %695 = vmatpush.bf16.msra.mxu2 %v1354_v6  ;;  %v1360_v15 = vld [vmem:[#allocation6 + $0xe0] sm:$0xff]  ;;  %v1359_v19 = vld [vmem:[#allocation6 + $0xd8] sm:$0xff]  ;;  %v1350_v22 = vld [vmem:[#allocation6 + $0x90] sm:$0xff] }
  0x20   :  { %709 = vmatpush.bf16.msra.mxu3 %v1362_v7  ;;  %v1358_v23 = vld [vmem:[#allocation6 + $0xd0] sm:$0xff]  ;;  %v1333_v24 = vld [vmem:[#allocation6 + $0x8] sm:$0xff]  ;;  %v1332_v28 = vld [vmem:[#allocation6] sm:$0xff] }
  0x21   :  { %668 = vmatpush.bf16.msra.mxu0 %v1337_v8  ;;  %v1341_v25 = vld [vmem:[#allocation6 + $0x48] sm:$0xff]  ;;  %v1340_v29 = vld [vmem:[#allocation6 + $0x40] sm:$0xff]  ;;  %v1371_v32 = vld [vmem:[#allocation6 + $0x138] sm:$0xff] }
  0x22   :  { %682 = vmatpush.bf16.msra.mxu1 %v1345_v9  ;;  %v1349_v26 = vld [vmem:[#allocation6 + $0x88] sm:$0xff]  ;;  %v1348_v30 = vld [vmem:[#allocation6 + $0x80] sm:$0xff]  ;;  %v1379_v33 = vld [vmem:[#allocation6 + $0x178] sm:$0xff] }
  0x23   :  { %696 = vmatpush.bf16.msra.mxu2 %v1353_v10  ;;  %v1357_v27 = vld [vmem:[#allocation6 + $0xc8] sm:$0xff]  ;;  %v1356_v31 = vld [vmem:[#allocation6 + $0xc0] sm:$0xff]  ;;  %v125_v34 = vld [vmem:[#allocation3 + $0x10] sm:$0xff] }
  0x24   :  { %710 = vmatpush.bf16.msra.mxu3 %v1361_v11  ;;  %v133_v35 = vld [vmem:[#allocation3 + $0x50] sm:$0xff]  ;;  %v126_v36 = vld [vmem:[#allocation3 + $0x18] sm:$0xff]  ;;  %v123_v38 = vld [vmem:[#allocation3] sm:$0xff] }
  0x25   :  { %669 = vmatpush.bf16.msra.mxu0 %v1336_v12  ;;  %v134_v37 = vld [vmem:[#allocation3 + $0x58] sm:$0xff]  ;;  %v131_v39 = vld [vmem:[#allocation3 + $0x40] sm:$0xff]  ;;  %v124_v40 = vld [vmem:[#allocation3 + $0x8] sm:$0xff]  ;;  %v141_v44 = vpack.c.bf16 %v133_v35, %v125_v34 }
  0x26   :  { %683 = vmatpush.bf16.msra.mxu1 %v1344_v13  ;;  %v132_v41 = vld [vmem:[#allocation3 + $0x48] sm:$0xff]  ;;  %v1387_v42 = vld [vmem:[#allocation6 + $0x1b8] sm:$0xff]  ;;  %v142_v45 = vpack.c.bf16 %v134_v37, %v126_v36  ;;  %v139_v46 = vpack.c.bf16 %v131_v39, %v123_v38  ;;  %v1370_v48 = vld [vmem:[#allocation6 + $0x130] sm:$0xff] }
  0x27   :  { %697 = vmatpush.bf16.msra.mxu2 %v1352_v14  ;;  %v1395_v43 = vld [vmem:[#allocation6 + $0x1f8] sm:$0xff]  ;;  %v140_v47 = vpack.c.bf16 %v132_v41, %v124_v40  ;;  %v1378_v49 = vld [vmem:[#allocation6 + $0x170] sm:$0xff]  ;;  %v1369_v52 = vld [vmem:[#allocation6 + $0x128] sm:$0xff] }
  0x28   :  { %711 = vmatpush.bf16.msra.mxu3 %v1360_v15  ;;  %v1386_v50 = vld [vmem:[#allocation6 + $0x1b0] sm:$0xff]  ;;  %v1377_v53 = vld [vmem:[#allocation6 + $0x168] sm:$0xff]  ;;  %v785_v54 = vld [vmem:[%s1770_s2] sm:$0xff] }
  0x29   :  { %670 = vmatpush.bf16.msra.mxu0 %v1335_v16  ;;  %v1394_v51 = vld [vmem:[#allocation6 + $0x1f0] sm:$0xff]  ;;  %v1385_v55 = vld [vmem:[#allocation6 + $0x1a8] sm:$0xff]  ;;  %792 = vperm.xlu0 %1425, %v785_v54   ;;  %v1368_v58 = vld [vmem:[#allocation6 + $0x120] sm:$0xff] }
  0x2a   :  { %684 = vmatpush.bf16.msra.mxu1 %v1343_v17  ;;  %v1393_v56 = vld [vmem:[#allocation6 + $0x1e8] sm:$0xff]  ;;  %v1376_v59 = vld [vmem:[#allocation6 + $0x160] sm:$0xff]  ;;  %v1367_v62 = vld [vmem:[#allocation6 + $0x118] sm:$0xff] }
  0x2b   :  { %698 = vmatpush.bf16.msra.mxu2 %v1351_v18  ;;  %v1384_v60 = vld [vmem:[#allocation6 + $0x1a0] sm:$0xff]  ;;  %v1375_v63 = vld [vmem:[#allocation6 + $0x158] sm:$0xff]  ;;  %v786_v0 = vld [vmem:[%s1770_s2 + $0x8] sm:$0xff] }
  0x2c   :  { %712 = vmatpush.bf16.msra.mxu3 %v1359_v19  ;;  %v1392_v61 = vld [vmem:[#allocation6 + $0x1e0] sm:$0xff]  ;;  %v1383_v1 = vld [vmem:[#allocation6 + $0x198] sm:$0xff]  ;;  %v1366_v3 = vld [vmem:[#allocation6 + $0x110] sm:$0xff] }
  0x2d   :  { %671 = vmatpush.bf16.msra.mxu0 %v1334_v20  ;;  %v1391_v2 = vld [vmem:[#allocation6 + $0x1d8] sm:$0xff]  ;;  %v1374_v4 = vld [vmem:[#allocation6 + $0x150] sm:$0xff]  ;;  %v1365_v7 = vld [vmem:[#allocation6 + $0x108] sm:$0xff] }
  0x2e   :  { %685 = vmatpush.bf16.msra.mxu1 %v1342_v21  ;;  %v1382_v5 = vld [vmem:[#allocation6 + $0x190] sm:$0xff]  ;;  %v1373_v8 = vld [vmem:[#allocation6 + $0x148] sm:$0xff]  ;;  %v1364_v11 = vld [vmem:[#allocation6 + $0x100] sm:$0xff] }
  0x2f   :  { %699 = vmatpush.bf16.msra.mxu2 %v1350_v22  ;;  %v1390_v6 = vld [vmem:[#allocation6 + $0x1d0] sm:$0xff]  ;;  %v1381_v9 = vld [vmem:[#allocation6 + $0x188] sm:$0xff]  ;;  %v1372_v12 = vld [vmem:[#allocation6 + $0x140] sm:$0xff] }
  0x30   :  { %713 = vmatpush.bf16.msra.mxu3 %v1358_v23  ;;  %v1389_v10 = vld [vmem:[#allocation6 + $0x1c8] sm:$0xff]  ;;  %v1380_v13 = vld [vmem:[#allocation6 + $0x180] sm:$0xff]  ;;  %v129_v19 = vld [vmem:[#allocation3 + $0x30] sm:$0xff] }
  0x31   :  { %672 = vmatpush.bf16.msra.mxu0 %v1333_v24  ;;  %797 = vperm.xlu0 %1425, %v786_v0   ;;  %v1388_v14 = vld [vmem:[#allocation6 + $0x1c0] sm:$0xff]  ;;  %v128_v17 = vld [vmem:[#allocation3 + $0x28] sm:$0xff]  ;;  %v137_v20 = vld [vmem:[#allocation3 + $0x70] sm:$0xff] }
  0x32   :  { %686 = vmatpush.bf16.msra.mxu1 %v1341_v25  ;;  %v127_v15 = vld [vmem:[#allocation3 + $0x20] sm:$0xff]  ;;  %v136_v18 = vld [vmem:[#allocation3 + $0x68] sm:$0xff]  ;;  %v130_v21 = vld [vmem:[#allocation3 + $0x38] sm:$0xff]  ;;  %v145_v25 = vpack.c.bf16 %v137_v20, %v129_v19 }
  0x33   :  { %700 = vmatpush.bf16.msra.mxu2 %v1349_v26  ;;  %v135_v16 = vld [vmem:[#allocation3 + $0x60] sm:$0xff]  ;;  %v138_v22 = vld [vmem:[#allocation3 + $0x78] sm:$0xff]  ;;  %v144_v24 = vpack.c.bf16 %v136_v18, %v128_v17 }
  0x34   :  { %714 = vmatpush.bf16.msra.mxu3 %v1357_v27  ;;  %v143_v23 = vpack.c.bf16 %v135_v16, %v127_v15  ;;  %v146_v26 = vpack.c.bf16 %v138_v22, %v130_v21 }
  0x35   :  { %673 = vmatpush.bf16.msra.mxu0 %v1332_v28 }
  0x36   :  { %687 = vmatpush.bf16.msra.mxu1 %v1340_v29 }
  0x37   :  { %701 = vmatpush.bf16.msra.mxu2 %v1348_v30 }
  0x38   :  { %715 = vmatpush.bf16.msra.mxu3 %v1356_v31  ;;  %674 = vmatmul.bf16.vlgmr.msra.gmra.mxu0 %v139_v46 }
  0x39   :  { %722 = vmatpush.bf16.msrb.mxu0 %v1371_v32  ;;  %688 = vmatmul.bf16.vlgmr.msra.gmra.mxu1 %v140_v47 }
  0x3a   :  { %736 = vmatpush.bf16.msrb.mxu1 %v1379_v33  ;;  %702 = vmatmul.bf16.vlgmr.msra.gmra.mxu2 %v141_v44  ;;  %v1426_v44 = vld [vmem:[%s1771_s3] ss:$0 sm:$0xff] }
  0x3b   :  { %750 = vmatpush.bf16.msrb.mxu2 %v1387_v42  ;;  %716 = vmatmul.bf16.vlgmr.msra.gmra.mxu3 %v142_v45 }
  0x3c   :  { %764 = vmatpush.bf16.msrb.mxu3 %v1395_v43 }
  0x3d   :  { %723 = vmatpush.bf16.msrb.mxu0 %v1370_v48  ;;  %v811_v48 = vlaneseq }
  0x3e   :  { %737 = vmatpush.bf16.msrb.mxu1 %v1378_v49 }
  0x3f   :  { %751 = vmatpush.bf16.msrb.mxu2 %v1386_v50 }
  0x40   :  { %765 = vmatpush.bf16.msrb.mxu3 %v1394_v51 }
  0x41   :  { %724 = vmatpush.bf16.msrb.mxu0 %v1369_v52 }
  0x42   :  { %738 = vmatpush.bf16.msrb.mxu1 %v1377_v53 }
  0x43   :  { %752 = vmatpush.bf16.msrb.mxu2 %v1385_v55  ;;  %v1726_v55 = vand.u32 127, %v811_v48  ;;  %v906_v48 = vld [vmem:[#allocation8 + $0x30] sm:$0xff] }
  0x44   :  { %766 = vmatpush.bf16.msrb.mxu3 %v1393_v56 }
  0x45   :  { %725 = vmatpush.bf16.msrb.mxu0 %v1368_v58  ;;  %vm813_vm0 = vcmp.lt.s32.totalorder %v1726_v55, 32 }
  0x46   :  { %739 = vmatpush.bf16.msrb.mxu1 %v1376_v59 }
  0x47   :  { %753 = vmatpush.bf16.msrb.mxu2 %v1384_v60 }
  0x48   :  { %767 = vmatpush.bf16.msrb.mxu3 %v1392_v61 }
  0x49   :  { %726 = vmatpush.bf16.msrb.mxu0 %v1367_v62 }
  0x4a   :  { %740 = vmatpush.bf16.msrb.mxu1 %v1375_v63 }
  0x4b   :  { %754 = vmatpush.bf16.msrb.mxu2 %v1383_v1 }
  0x4c   :  { %768 = vmatpush.bf16.msrb.mxu3 %v1391_v2 }
  0x4d   :  { %727 = vmatpush.bf16.msrb.mxu0 %v1366_v3 }
  0x4e   :  { %741 = vmatpush.bf16.msrb.mxu1 %v1374_v4 }
  0x4f   :  { %755 = vmatpush.bf16.msrb.mxu2 %v1382_v5 }
  0x50   :  { %769 = vmatpush.bf16.msrb.mxu3 %v1390_v6 }
  0x51   :  { %728 = vmatpush.bf16.msrb.mxu0 %v1365_v7 }
  0x52   :  { %742 = vmatpush.bf16.msrb.mxu1 %v1373_v8 }
  0x53   :  { %756 = vmatpush.bf16.msrb.mxu2 %v1381_v9 }
  0x54   :  { %770 = vmatpush.bf16.msrb.mxu3 %v1389_v10 }
  0x55   :  { %729 = vmatpush.bf16.msrb.mxu0 %v1364_v11 }
  0x56   :  { %743 = vmatpush.bf16.msrb.mxu1 %v1372_v12 }
  0x57   :  { %757 = vmatpush.bf16.msrb.mxu2 %v1380_v13 }
  0x58   :  { %771 = vmatpush.bf16.msrb.mxu3 %v1388_v14  ;;  %730 = vmatmul.bf16.vlgmr.msrb.gmra.mxu0 %v143_v23 }
  0x59   :  { %744 = vmatmul.bf16.vlgmr.msrb.gmra.mxu1 %v144_v24 }
  0x5a   :  { %758 = vmatmul.bf16.vlgmr.msrb.gmra.mxu2 %v145_v25 }
  0x5b   :  { %772 = vmatmul.bf16.vlgmr.msrb.gmra.mxu3 %v146_v26 }
  0x9b   :  { %v793_v45 = vpop.permute.xlu0 %792 }
  0x9c   :  { %v803_v52 = vadd.f32 %v1426_v44, %v793_v45  ;;  %v907_v45 = vld [vmem:[#allocation8 + $0x38] sm:$0xff] }
  0xa3   :  { %v798_v63 = vpop.permute.xlu0 %797 }
  0xa4   :  { %v804_v3 = vadd.f32 %v1426_v44, %v798_v63  ;;  %v901_v63 = vld [vmem:[#allocation8 + $0x8] sm:$0xff] }
  0xb5   :  { %v675_v27 = vpop.f32.mrf.mxu0 }
  0xb6   :  { %v689_v28 = vpop.f32.mrf.mxu1 }
  0xb7   :  { %v690_v31 = vadd.f32 %v689_v28, %v675_v27 }
  0xbd   :  { %v703_v29 = vpop.f32.mrf.mxu2  ;;  %v677_v32 = vpop.f32.mrf.mxu0 }
  0xbe   :  { %v717_v30 = vpop.f32.mrf.mxu3  ;;  %v691_v33 = vpop.f32.mrf.mxu1  ;;  %v704_v34 = vadd.f32 %v703_v29, %v690_v31 }
  0xbf   :  { %v692_v38 = vadd.f32 %v691_v33, %v677_v32  ;;  %v915_v32 = vld [vmem:[#allocation8 + $0x78] sm:$0xff]  ;;  %v914_v33 = vld [vmem:[#allocation8 + $0x70] sm:$0xff] }
  0xc0   :  { %v718_v37 = vadd.f32 %v717_v30, %v704_v34  ;;  %920 = vmatpush.msra.mxu0 %v915_v32  ;;  %1396 = vmatpush.msra.mxu3 %v915_v32  ;;  %v913_v34 = vld [vmem:[#allocation8 + $0x68] sm:$0xff] }
  0xc1   :  { %v1003_v32 = vld [vmem:[#allocation11 + $0x68] sm:$0xff] }
  0xc2   :  { %921 = vmatpush.msra.mxu0 %v914_v33  ;;  %1397 = vmatpush.msra.mxu3 %v914_v33 }
  0xc4   :  { %922 = vmatpush.msra.mxu0 %v913_v34  ;;  %1398 = vmatpush.msra.mxu3 %v913_v34  ;;  %v1002_v34 = vld [vmem:[#allocation11 + $0x60] sm:$0xff] }
  0xc5   :  { %v705_v35 = vpop.f32.mrf.mxu2 }
  0xc6   :  { %v719_v36 = vpop.f32.mrf.mxu3  ;;  %v706_v42 = vadd.f32 %v705_v35, %v692_v38  ;;  %v911_v38 = vld [vmem:[#allocation8 + $0x58] sm:$0xff] }
  0xc8   :  { %v720_v49 = vadd.f32 %v719_v36, %v706_v42  ;;  %v912_v36 = vld [vmem:[#allocation8 + $0x60] sm:$0xff] }
  0xc9   :  { %923 = vmatpush.msra.mxu0 %v912_v36  ;;  %1399 = vmatpush.msra.mxu3 %v912_v36 }
  0xcb   :  { %924 = vmatpush.msra.mxu0 %v911_v38  ;;  %1400 = vmatpush.msra.mxu3 %v911_v38 }
  0xd5   :  { %v731_v39 = vpop.f32.mrf.mxu0 }
  0xd6   :  { %v732_v40 = vadd.f32 %v731_v39, %v718_v37  ;;  %v745_v41 = vpop.f32.mrf.mxu1 }
  0xd8   :  { %v746_v43 = vadd.f32 %v745_v41, %v732_v40  ;;  %v910_v40 = vld [vmem:[#allocation8 + $0x50] sm:$0xff]  ;;  %v909_v41 = vld [vmem:[#allocation8 + $0x48] sm:$0xff] }
  0xd9   :  { %925 = vmatpush.msra.mxu0 %v910_v40  ;;  %1401 = vmatpush.msra.mxu3 %v910_v40 }
  0xdb   :  { %926 = vmatpush.msra.mxu0 %v909_v41  ;;  %1402 = vmatpush.msra.mxu3 %v909_v41 }
  0xdd   :  { %v759_v46 = vpop.f32.mrf.mxu2  ;;  %v733_v51 = vpop.f32.mrf.mxu0 }
  0xde   :  { %v773_v47 = vpop.f32.mrf.mxu3  ;;  %v760_v50 = vadd.f32 %v759_v46, %v746_v43  ;;  %v734_v54 = vadd.f32 %v733_v51, %v720_v49  ;;  %v747_v57 = vpop.f32.mrf.mxu1  ;;  %v908_v43 = vld [vmem:[#allocation8 + $0x40] sm:$0xff] }
  0xdf   :  { %927 = vmatpush.msra.mxu0 %v908_v43  ;;  %1403 = vmatpush.msra.mxu3 %v908_v43  ;;  %v999_v43 = vld [vmem:[#allocation11 + $0x48] sm:$0xff] }
  0xe0   :  { %v774_v53 = vadd.f32 %v773_v47, %v760_v50  ;;  %v748_v59 = vadd.f32 %v747_v57, %v734_v54  ;;  %v905_v50 = vld [vmem:[#allocation8 + $0x28] sm:$0xff] }
  0xe1   :  { %928 = vmatpush.msra.mxu0 %v907_v45  ;;  %1404 = vmatpush.msra.mxu3 %v907_v45  ;;  %v998_v45 = vld [vmem:[#allocation11 + $0x40] sm:$0xff] }
  0xe2   :  { %v805_v56 = vmul.f32 2.0, %v774_v53 }
  0xe3   :  { %929 = vmatpush.msra.mxu0 %v906_v48  ;;  %1405 = vmatpush.msra.mxu3 %v906_v48 }
  0xe4   :  { %v807_v58 = vsub.f32 %v803_v52, %v805_v56 }
  0xe5   :  { %v761_v60 = vpop.f32.mrf.mxu2  ;;  %930 = vmatpush.msra.mxu0 %v905_v50  ;;  %1406 = vmatpush.msra.mxu3 %v905_v50  ;;  %v997_v50 = vld [vmem:[#allocation11 + $0x38] sm:$0xff] }
  0xe6   :  { %v809_v61 = vmax.f32 %v807_v58, 0.0  ;;  %v762_v62 = vadd.f32 %v761_v60, %v748_v59  ;;  %v775_v0 = vpop.f32.mrf.mxu3  ;;  %v904_v60 = vld [vmem:[#allocation8 + $0x20] sm:$0xff] }
  0xe7   :  { %931 = vmatpush.msra.mxu0 %v904_v60  ;;  %1407 = vmatpush.msra.mxu3 %v904_v60 }
  0xe8   :  { %v776_v1 = vadd.f32 %v775_v0, %v762_v62  ;;  %v1731_v2 = vsel %vm813_vm0, %v809_v61, 3e+38  ;;  %1430 = vrsqrt.f32 %v809_v61  ;;  %vm861_vm1 = vcmp.eq.f32.partialorder %v809_v61, inf  ;;  %v902_v62 = vld [vmem:[#allocation8 + $0x10] sm:$0xff]  ;;  %v960_v0 = vld [vmem:[#allocation9 + $0x78] sm:$0xff] }
  0xe9   :  { %816 = vmin.xlane.f32.xlu0 %v1731_v2  ;;  %v864_v17 = vand.u32 2147483648, %v809_v61  ;;  %vm863_vm2 = vcmp.eq.f32.partialorder %v809_v61, 0.0  ;;  %965 = vmatpush.msra.mxu1 %v960_v0 }
  0xea   :  { %v806_v4 = vmul.f32 2.0, %v776_v1  ;;  %v959_v1 = vld [vmem:[#allocation9 + $0x70] sm:$0xff] }
  0xeb   :  { %966 = vmatpush.msra.mxu1 %v959_v1 }
  0xec   :  { %v808_v5 = vsub.f32 %v804_v3, %v806_v4  ;;  %v957_v3 = vld [vmem:[#allocation9 + $0x60] sm:$0xff]  ;;  %v956_v4 = vld [vmem:[#allocation9 + $0x58] sm:$0xff] }
  0xee   :  { %v1431_v6 = vpop.eup %1430  ;;  %v810_v7 = vmax.f32 %v808_v5, 0.0  ;;  %v955_v5 = vld [vmem:[#allocation9 + $0x50] sm:$0xff] }
  0xef   :  { %v855_v8 = vmul.f32 %v1431_v6, %v809_v61 }
  0xf0   :  { %1432 = vrsqrt.f32 %v810_v7  ;;  %vm873_vm3 = vcmp.eq.f32.partialorder %v810_v7, inf  ;;  %v876_v26 = vand.u32 2147483648, %v810_v7  ;;  %vm875_vm4 = vcmp.eq.f32.partialorder %v810_v7, 0.0 }
  0xf1   :  { %v856_v9 = vmul.f32 %v1431_v6, %v855_v8  ;;  %v815_v31 = vsel %vm813_vm0, %v810_v7, 3e+38 }
  0xf3   :  { %v857_v10 = vmul.f32 0.5, %v856_v9  ;;  %v952_v9 = vld [vmem:[#allocation9 + $0x38] sm:$0xff] }
  0xf5   :  { %v858_v11 = vsub.f32 1.5, %v857_v10  ;;  %v951_v10 = vld [vmem:[#allocation9 + $0x30] sm:$0xff] }
  0xf6   :  { %v1433_v12 = vpop.eup %1432 }
  0xf7   :  { %v859_v13 = vmul.f32 %v1431_v6, %v858_v11  ;;  %v867_v14 = vmul.f32 %v1433_v12, %v810_v7  ;;  %v954_v6 = vld [vmem:[#allocation9 + $0x48] sm:$0xff] }
  0xf8   :  { %v950_v11 = vld [vmem:[#allocation9 + $0x28] sm:$0xff] }
  0xf9   :  { %v860_v15 = vmul.f32 %v859_v13, %v809_v61  ;;  %v868_v16 = vmul.f32 %v1433_v12, %v867_v14 }
  0xfb   :  { %v862_v18 = vsel %vm861_vm1, %v809_v61, %v860_v15  ;;  %v869_v19 = vmul.f32 0.5, %v868_v16  ;;  %v903_v61 = vld [vmem:[#allocation8 + $0x18] sm:$0xff] }
  0xfc   :  { %v865_v20 = vsel %vm863_vm2, %v864_v17, %v862_v18  ;;  %932 = vmatpush.msra.mxu0 %v903_v61  ;;  %1408 = vmatpush.msra.mxu3 %v903_v61  ;;  %v992_v61 = vld [vmem:[#allocation11 + $0x10] sm:$0xff] }
  0xfd   :  { %v878_v21 = vmul.f32 -2.0, %v865_v20  ;;  %v870_v22 = vsub.f32 1.5, %v869_v19 }
  0xfe   :  { %933 = vmatpush.msra.mxu0 %v902_v62  ;;  %1409 = vmatpush.msra.mxu3 %v902_v62  ;;  %v991_v62 = vld [vmem:[#allocation11 + $0x8] sm:$0xff] }
  0xff   :  { %v880_v23 = vsel %vm813_vm0, %v878_v21, -1e+30  ;;  %v871_v24 = vmul.f32 %v1433_v12, %v870_v22 }
 0x100   :  { %882 = vmax.xlane.f32.xlu1 %v880_v23  ;;  %934 = vmatpush.msra.mxu0 %v901_v63 }
 0x101   :  { %v872_v25 = vmul.f32 %v871_v24, %v810_v7  ;;  %1410 = vmatpush.msra.mxu3 %v901_v63  ;;  %v990_v63 = vld [vmem:[#allocation11] sm:$0xff] }
 0x103   :  { %v874_v27 = vsel %vm873_vm3, %v810_v7, %v872_v25  ;;  %v953_v7 = vld [vmem:[#allocation9 + $0x40] sm:$0xff] }
 0x104   :  { %v877_v28 = vsel %vm875_vm4, %v876_v26, %v874_v27  ;;  %v949_v25 = vld [vmem:[#allocation9 + $0x20] sm:$0xff]  ;;  %v948_v26 = vld [vmem:[#allocation9 + $0x18] sm:$0xff]  ;;  %v947_v27 = vld [vmem:[#allocation9 + $0x10] sm:$0xff] }
 0x105   :  { %v879_v29 = vmul.f32 -2.0, %v877_v28  ;;  %v946_v28 = vld [vmem:[#allocation9 + $0x8] sm:$0xff] }
 0x107   :  { %v881_v30 = vsel %vm813_vm0, %v879_v29, -1e+30  ;;  %v945_v29 = vld [vmem:[#allocation9] sm:$0xff] }
 0x108   :  { %884 = vmax.xlane.f32.xlu1 %v881_v30 }
 0x110   :  { %818 = vmin.xlane.f32.xlu1 %v815_v31 }
 0x15c   :  { %v817_v49 = vpop.xlane.xlu0 %816 }
 0x15d   :  { %vm820_vm5 = vcmp.eq.f32.partialorder %v1731_v2, %v817_v49  ;;  %v958_v2 = vld [vmem:[#allocation9 + $0x68] sm:$0xff] }
 0x15e   :  { %v822_v54 = vsel %vm820_vm5, %v1726_v55, 128  ;;  %967 = vmatpush.msra.mxu1 %v958_v2 }
 0x15f   :  { %v825_v58 = vshra.s32 %v822_v54, 16  ;;  %v824_v18 = vand.u32 65535, %v822_v54  ;;  %v995_v54 = vld [vmem:[#allocation11 + $0x28] sm:$0xff] }
 0x160   :  { %968 = vmatpush.msra.mxu1 %v957_v3 }
 0x161   :  { %v827_v59 = vcvt.s32.f32 %v825_v58 }
 0x162   :  { %969 = vmatpush.msra.mxu1 %v956_v4 }
 0x164   :  { %970 = vmatpush.msra.mxu1 %v955_v5 }
 0x166   :  { %971 = vmatpush.msra.mxu1 %v954_v6  ;;  %v1429_v6 = vld [vmem:[%s1777_s9] ss:$0 sm:$0xff] }
 0x168   :  { %972 = vmatpush.msra.mxu1 %v953_v7 }
 0x16a   :  { %973 = vmatpush.msra.mxu1 %v952_v9 }
 0x16c   :  { %974 = vmatpush.msra.mxu1 %v951_v10 }
 0x16e   :  { %975 = vmatpush.msra.mxu1 %v950_v11 }
 0x170   :  { %976 = vmatpush.msra.mxu1 %v949_v25 }
 0x172   :  { %977 = vmatpush.msra.mxu1 %v948_v26 }
 0x173   :  { %v883_v35 = vpop.xlane.xlu1 %882 }
 0x174   :  { %v886_v37 = vsub.f32 %v880_v23, %v883_v35  ;;  %v826_v23 = vcvt.s32.f32 %v824_v18  ;;  %978 = vmatpush.msra.mxu1 %v947_v27  ;;  %v1001_v35 = vld [vmem:[#allocation11 + $0x58] sm:$0xff] }
 0x176   :  { %v888_v39 = vmul.f32 1.442695, %v886_v37  ;;  %979 = vmatpush.msra.mxu1 %v946_v28 }
 0x178   :  { %1434 = vpow2.f32 %v888_v39  ;;  %980 = vmatpush.msra.mxu1 %v945_v29  ;;  %v1000_v39 = vld [vmem:[#allocation11 + $0x50] sm:$0xff] }
 0x17b   :  { %v885_v42 = vpop.xlane.xlu1 %884 }
 0x17c   :  { %v887_v44 = vsub.f32 %v881_v30, %v885_v42  ;;  %v1005_v30 = vld [vmem:[#allocation11 + $0x78] sm:$0xff]  ;;  %v1427_v42 = vld [vmem:[%s1773_s5] ss:$0 sm:$0xff] }
 0x17d   :  { %1010 = vmatpush.msra.mxu2 %v1005_v30 }
 0x17e   :  { %v1740_v46 = vpop.eup %1434  ;;  %v890_v47 = vmul.f32 1.442695, %v887_v44 }
 0x17f   :  { %892 = vadd.xlane.f32.xlu2 %v1740_v46 }
 0x180   :  { %1436 = vpow2.f32 %v890_v47 }
 0x183   :  { %v819_v51 = vpop.xlane.xlu1 %818 }
 0x184   :  { %vm821_vm6 = vcmp.eq.f32.partialorder %v815_v31, %v819_v51  ;;  %v1004_v31 = vld [vmem:[#allocation11 + $0x70] sm:$0xff] }
 0x185   :  { %v823_v52 = vsel %vm821_vm6, %v1726_v55, 128  ;;  %v900_v55 = vld [vmem:[#allocation8] sm:$0xff]  ;;  %1011 = vmatpush.msra.mxu2 %v1004_v31 }
 0x186   :  { %v1437_v53 = vpop.eup %1436  ;;  %v839_v56 = vshra.s32 %v823_v52, 16  ;;  %935 = vmatpush.msra.mxu0 %v900_v55  ;;  %1411 = vmatpush.msra.mxu3 %v900_v55  ;;  %v838_v13 = vand.u32 65535, %v823_v52  ;;  %v1428_v55 = vld [vmem:[%s1775_s7] ss:$0 sm:$0xff] }
 0x187   :  { %894 = vadd.xlane.f32.xlu2 %v1437_v53  ;;  %1012 = vmatpush.msra.mxu2 %v1003_v32 }
 0x188   :  { %v841_v57 = vcvt.s32.f32 %v839_v56  ;;  %v840_v17 = vcvt.s32.f32 %v838_v13  ;;  %v994_v56 = vld [vmem:[#allocation11 + $0x20] sm:$0xff] }
 0x189   :  { %1013 = vmatpush.msra.mxu2 %v1002_v34 }
 0x18a   :  { %842 = vmin.xlane.f32.xlu1 %v841_v57 }
 0x18b   :  { %1014 = vmatpush.msra.mxu2 %v1001_v35 }
 0x18d   :  { %1015 = vmatpush.msra.mxu2 %v1000_v39 }
 0x18f   :  { %828 = vmin.xlane.f32.xlu2 %v827_v59  ;;  %1016 = vmatpush.msra.mxu2 %v999_v43 }
 0x191   :  { %1017 = vmatpush.msra.mxu2 %v998_v45 }
 0x193   :  { %1018 = vmatpush.msra.mxu2 %v997_v50 }
 0x1f2   :  { %v893_v8 = vpop.xlane.xlu2 %892 }
 0x1f3   :  { %1438 = vrcp.f32 %v893_v8 }
 0x1f9   :  { %v1439_v12 = vpop.eup %1438 }
 0x1fa   :  { %v895_v14 = vpop.xlane.xlu2 %894  ;;  %v898_v15 = vmul.f32 %v1439_v12, %v1740_v46 }
 0x1fb   :  { %1440 = vrcp.f32 %v895_v14 }
 0x1fc   :  { %936 = vmatmul.f32.vlgmr.msra.gmra.mxu0 %v898_v15 }
 0x1fd   :  { %v843_v16 = vpop.xlane.xlu1 %842 }
 0x1fe   :  { %vm844_vm7 = vcmp.eq.f32.partialorder %v841_v57, %v843_v16  ;;  %v849_v33 = vcvt.f32.s32 %v843_v16  ;;  %v993_v57 = vld [vmem:[#allocation11 + $0x18] sm:$0xff] }
 0x1ff   :  { %v845_v19 = vsel %vm844_vm7, %v840_v17, inf }
 0x200   :  { %846 = vmin.xlane.f32.xlu1 %v845_v19  ;;  %v850_v37 = vshll.u32 %v849_v33, 16 }
 0x201   :  { %v1441_v20 = vpop.eup %1440 }
 0x202   :  { %v829_v21 = vpop.xlane.xlu2 %828  ;;  %v899_v22 = vmul.f32 %v1441_v20, %v1437_v53  ;;  %v996_v53 = vld [vmem:[#allocation11 + $0x30] sm:$0xff] }
 0x203   :  { %vm830_vm8 = vcmp.eq.f32.partialorder %v827_v59, %v829_v21  ;;  %v835_v40 = vcvt.f32.s32 %v829_v21  ;;  %1019 = vmatpush.msra.mxu2 %v996_v53 }
 0x204   :  { %939 = vmatmul.f32.vlgmr.msra.gmra.mxu3 %v899_v22  ;;  %v831_v24 = vsel %vm830_vm8, %v826_v23, inf }
 0x205   :  { %832 = vmin.xlane.f32.xlu2 %v831_v24  ;;  %v836_v46 = vshll.u32 %v835_v40, 16  ;;  %1020 = vmatpush.msra.mxu2 %v995_v54 }
 0x207   :  { %1021 = vmatpush.msra.mxu2 %v994_v56 }
 0x209   :  { %1022 = vmatpush.msra.mxu2 %v993_v57 }
 0x20b   :  { %1023 = vmatpush.msra.mxu2 %v992_v61 }
 0x20d   :  { %1024 = vmatpush.msra.mxu2 %v991_v62 }
 0x20f   :  { %1025 = vmatpush.msra.mxu2 %v990_v63 }
 0x273   :  { %v847_v36 = vpop.xlane.xlu1 %846 }
 0x274   :  { %v848_v38 = vcvt.f32.s32 %v847_v36 }
 0x276   :  { %v851_v41 = vadd.s32 %v850_v37, %v848_v38 }
 0x278   :  { %853 = vst [vmem:[#allocation13 + $0x8] sm:$0xff] %v851_v41  ;;  %v833_v44 = vpop.xlane.xlu2 %832 }
 0x279   :  { %v834_v47 = vcvt.f32.s32 %v833_v44  ;;  %v937_v48 = vpop.f32.mrf.mxu0 }
 0x27a   :  { %v938_v49 = vadd.f32 %v1427_v42, %v937_v48 }
 0x27b   :  { %v837_v51 = vadd.s32 %v836_v46, %v834_v47 }
 0x27c   :  { %v943_v52 = vmax.f32 %v938_v49, 0.0 }
 0x27d   :  { %852 = vst [vmem:[#allocation13] sm:$0xff] %v837_v51 }
 0x27e   :  { %981 = vmatmul.f32.vlgmr.msra.gmra.mxu1 %v943_v52  ;;  %1060 = dma.vmem_to_hbm [thread:$0]  %s1053_s12, 256, %s1055_s16, [#allocation14], %s1624_s1, %s1624_s1, %s1625_s13  }
 0x287   :  { %v940_v58 = vpop.f32.mrf.mxu3 }
 0x288   :  { %v941_v59 = vadd.f32 %v1427_v42, %v940_v58 }
 0x28a   :  { %v944_v60 = vmax.f32 %v941_v59, 0.0 }
 0x28c   :  { %984 = vmatmul.f32.gmra.mxu1 %v944_v60 }
 0x2fb   :  { %v982_v0 = vpop.f32.mrf.mxu1 }
 0x2fc   :  { %v983_v1 = vadd.f32 %v1428_v55, %v982_v0 }
 0x2fe   :  { %v988_v2 = vmax.f32 %v983_v1, 0.0 }
 0x300   :  { %1026 = vmatmul.f32.vlgmr.msra.gmra.mxu2 %v988_v2 }
 0x309   :  { %v985_v3 = vpop.f32.mrf.mxu1 }
 0x30a   :  { %v986_v4 = vadd.f32 %v1428_v55, %v985_v3 }
 0x30c   :  { %v989_v5 = vmax.f32 %v986_v4, 0.0 }
 0x30e   :  { %1029 = vmatmul.f32.gmra.mxu2 %v989_v5 }
 0x383   :  { %v1027_v7 = vpop.f32.mrf.mxu2 }
 0x384   :  { %v1028_v8 = vadd.f32 %v1429_v6, %v1027_v7 }
 0x386   :  { %1033 = vst [vmem:[#allocation12] sm:$0xff] %v1028_v8 }
 0x391   :  { %v1030_v9 = vpop.f32.mrf.mxu2 }
 0x392   :  { %v1031_v10 = vadd.f32 %v1429_v6, %v1030_v9 }
 0x394   :  { %1034 = vst [vmem:[#allocation12 + $0x8] sm:$0xff] %v1031_v10 }
 0x395   :  { %1047 = dma.vmem_to_hbm [thread:$0]  %s1040_s18, 256, %s1042_s20, [#allocation5], %s1624_s1, %s1624_s1, %s1625_s13  }
 0x396   :  { %1616 = dma.done.wait [#allocation5], 256  }
 0x397   :  { %1617 = vsyncadd [#allocation5], 4294967040 }
 0x398   :  { %1618 = dma.done.wait [#allocation14], 256  }
 0x399   :  { %1619 = vsyncadd [#allocation14], 4294967040 }
 0x39a   :  { %1069 = vsyncpa [#allocation4], 1 }
 0x39b   :  { %1070 = vsyncpa [#allocation7], 1 }
 0x39c   :  { %1071 = vsyncpa [#allocation10], 1 }
 0x39d   :  { %1072 = vsyncpa [#allocation5], 1 }
 0x39e   :  { %1073 = vsyncpa [#allocation14], 1 }

// kernel: tpu_custom_call.1
= control target key start
LH: loop header
LB: loop body
LE: loop exit
PB: predicated region body
PF: predicated region fallthrough
CT: control target
= control target key end

     0   :  { %17 = vsyncpa [#allocation4], 0  ;;  %s1768_s0 = inlined_call_operand.hbm [shape: f32[16,1024], index: 0, kind: input, shape index: {}]   ;;  %s1769_s1 = inlined_call_operand.hbm [shape: bf16[1024,128], index: 1, kind: input, shape index: {}]   ;;  %s1770_s2 = inlined_call_operand.vmem [shape: f32[16,1], index: 2, kind: input, shape index: {}]   ;;  %s1771_s3 = inlined_call_operand.vmem [shape: f32[1,128], index: 3, kind: input, shape index: {}]   ;;  %s1772_s4 = inlined_call_operand.hbm [shape: f32[128,128], index: 4, kind: input, shape index: {}]   ;;  %s1773_s5 = inlined_call_operand.vmem [shape: f32[1,128], index: 5, kind: input, shape index: {}]   ;;  %s1774_s6 = inlined_call_operand.hbm [shape: f32[128,128], index: 6, kind: input, shape index: {}]   ;;  %s1775_s7 = inlined_call_operand.vmem [shape: f32[1,128], index: 7, kind: input, shape index: {}]   ;;  %s1776_s8 = inlined_call_operand.hbm [shape: f32[128,128], index: 8, kind: input, shape index: {}]   ;;  %s1777_s9 = inlined_call_operand.vmem [shape: f32[1,128], index: 9, kind: input, shape index: {}]   ;;  %s1778_s10 = inlined_call_operand.hbm [shape: f32[16,128], index: 10, kind: output, shape index: {0}]   ;;  %s1779_s11 = inlined_call_operand.hbm [shape: s32[16,128], index: 11, kind: output, shape index: {1}]  }
   0x1   :  { %18 = vsyncpa [#allocation7], 0 }
   0x2   :  { %19 = vsyncpa [#allocation10], 0 }
   0x3   :  { %20 = vsyncpa [#allocation5], 0  ;;  %s39_s19 = sshll.u32 %s1769_s1, 4  ;;  %s40_s19 = int_to_ptr.hbm [resolvable:$true] %s39_s19 }
   0x4   :  { %21 = vsyncpa [#allocation14], 0  ;;  %s1620_s20 = smov [#allocation6]   ;;  %s1621_s22 = smov 64  }
   0x5   :  { %s41_s21 = sshll.u32 %s1620_s20, 4  ;;  %s1622_s23 = smov 4   ;;  %s42_s21 = int_to_ptr.vmem [resolvable:$true] %s41_s21 }
   0x6   :  { %47 = dma.hbm_to_vmem [thread:$0]  %s40_s19, 8192, %s42_s21, [#allocation7], %s1621_s22, %s1621_s22, %s1622_s23  }
   0x7   :  { %s71_s26 = sshll.u32 %s1774_s6, 4  ;;  %s1623_s27 = smov [#allocation9]   ;;  %s72_s26 = int_to_ptr.hbm [resolvable:$true] %s71_s26 }
   0x8   :  { %s73_s28 = sshll.u32 %s1623_s27, 4  ;;  %s26_s12 = sshll.u32 %s1768_s0, 4  ;;  %s74_s28 = int_to_ptr.vmem [resolvable:$true] %s73_s28  ;;  %s27_s12 = int_to_ptr.hbm [resolvable:$true] %s26_s12 }
   0x9   :  { %s1624_s1 = smov 128   ;;  %s1625_s13 = smov 8  }
   0xa   :  { %79 = dma.hbm_to_vmem [thread:$0]  %s72_s26, 2048, %s74_s28, [#allocation10], %s1624_s1, %s1624_s1, %s1625_s13  }
   0xb   :  { %s1626_s14 = smov [#allocation3]   ;;  %s56_s6 = sshll.u32 %s1772_s4, 4  ;;  %s57_s6 = int_to_ptr.hbm [resolvable:$true] %s56_s6 }
   0xc   :  { %s28_s15 = sshll.u32 %s1626_s14, 4  ;;  %s1627_s18 = smov 1024   ;;  %s29_s15 = int_to_ptr.vmem [resolvable:$true] %s28_s15 }
   0xd   :  { %34 = dma.hbm_to_vmem [thread:$0]  %s27_s12, 2048, %s29_s15, [#allocation4], %s1627_s18, %s1627_s18, %s1621_s22  }
   0xe   :  { %s86_s20 = sshll.u32 %s1776_s8, 4  ;;  %s1628_s21 = smov [#allocation8]   ;;  %s87_s20 = int_to_ptr.hbm [resolvable:$true] %s86_s20 }
   0xf   :  { %s58_s23 = sshll.u32 %s1628_s21, 4  ;;  %s1629_s24 = smov [#allocation11]   ;;  %s59_s23 = int_to_ptr.vmem [resolvable:$true] %s58_s23 }
  0x10   :  { %64 = dma.hbm_to_vmem [thread:$0]  %s57_s6, 2048, %s59_s23, [#allocation7], %s1624_s1, %s1624_s1, %s1625_s13  }
  0x11   :  { %s88_s25 = sshll.u32 %s1629_s24, 4  ;;  %s89_s25 = int_to_ptr.vmem [resolvable:$true] %s88_s25 }
  0x12   :  { %94 = dma.hbm_to_vmem [thread:$0]  %s87_s20, 2048, %s89_s25, [#allocation10], %s1624_s1, %s1624_s1, %s1625_s13  }
  0x13   :  { %1610 = dma.done.wait [#allocation4], 2048  }
  0x14   :  { %1611 = vsyncadd [#allocation4], 4294965248 }
  0x15   :  { %1612 = dma.done.wait [#allocation7], 10240  }
  0x16   :  { %1613 = vsyncadd [#allocation7], 4294957056 }
  0x17   :  { %1614 = dma.done.wait [#allocation10], 4096  }
  0x18   :  { %1615 = vsyncadd [#allocation10], 4294963200  ;;  %v1339_v0 = vld [vmem:[#allocation6 + $0x38] sm:$0xff]  ;;  %v1338_v4 = vld [vmem:[#allocation6 + $0x30] sm:$0xff]  ;;  %v1630_v57 = vmov 0   ;;  %s1631_s30 = smov [#allocation13]  }
  0x19   :  { %v1347_v1 = vld [vmem:[#allocation6 + $0x78] sm:$0xff]  ;;  %666 = vmatpush.bf16.msra.mxu0 %v1339_v0  ;;  %v1346_v5 = vld [vmem:[#allocation6 + $0x70] sm:$0xff]  ;;  %v1337_v8 = vld [vmem:[#allocation6 + $0x28] sm:$0xff]  ;;  %1425 = vset.pattern.permute.xlu0 %v1630_v57  ;;  %s1052_s12 = sshll.u32 %s1631_s30, 4  ;;  %s1054_s16 = sshll.u32 %s1779_s11, 4  ;;  %s1053_s12 = int_to_ptr.vmem [resolvable:$true] %s1052_s12  ;;  %s1055_s16 = int_to_ptr.hbm [resolvable:$true] %s1054_s16 }
  0x1a   :  { %v1355_v2 = vld [vmem:[#allocation6 + $0xb8] sm:$0xff]  ;;  %680 = vmatpush.bf16.msra.mxu1 %v1347_v1  ;;  %v1354_v6 = vld [vmem:[#allocation6 + $0xb0] sm:$0xff]  ;;  %v1345_v9 = vld [vmem:[#allocation6 + $0x68] sm:$0xff]  ;;  %s1632_s6 = smov [#allocation12]   ;;  %s1041_s20 = sshll.u32 %s1778_s10, 4  ;;  %s1042_s20 = int_to_ptr.hbm [resolvable:$true] %s1041_s20 }
  0x1b   :  { %v1363_v3 = vld [vmem:[#allocation6 + $0xf8] sm:$0xff]  ;;  %694 = vmatpush.bf16.msra.mxu2 %v1355_v2  ;;  %v1362_v7 = vld [vmem:[#allocation6 + $0xf0] sm:$0xff]  ;;  %v1353_v10 = vld [vmem:[#allocation6 + $0xa8] sm:$0xff]  ;;  %s1039_s18 = sshll.u32 %s1632_s6, 4  ;;  %s1040_s18 = int_to_ptr.vmem [resolvable:$true] %s1039_s18 }
  0x1c   :  { %708 = vmatpush.bf16.msra.mxu3 %v1363_v3  ;;  %v1361_v11 = vld [vmem:[#allocation6 + $0xe8] sm:$0xff]  ;;  %v1336_v12 = vld [vmem:[#allocation6 + $0x20] sm:$0xff]  ;;  %v1335_v16 = vld [vmem:[#allocation6 + $0x18] sm:$0xff] }
  0x1d   :  { %667 = vmatpush.bf16.msra.mxu0 %v1338_v4  ;;  %v1344_v13 = vld [vmem:[#allocation6 + $0x60] sm:$0xff]  ;;  %v1343_v17 = vld [vmem:[#allocation6 + $0x58] sm:$0xff]  ;;  %v1334_v20 = vld [vmem:[#allocation6 + $0x10] sm:$0xff] }
  0x1e   :  { %681 = vmatpush.bf16.msra.mxu1 %v1346_v5  ;;  %v1352_v14 = vld [vmem:[#allocation6 + $0xa0] sm:$0xff]  ;;  %v1351_v18 = vld [vmem:[#allocation6 + $0x98] sm:$0xff]  ;;  %v1342_v21 = vld [vmem:[#allocation6 + $0x50] sm:$0xff] }
  0x1f   :  { %695 = vmatpush.bf16.msra.mxu2 %v1354_v6  ;;  %v1360_v15 = vld [vmem:[#allocation6 + $0xe0] sm:$0xff]  ;;  %v1359_v19 = vld [vmem:[#allocation6 + $0xd8] sm:$0xff]  ;;  %v1350_v22 = vld [vmem:[#allocation6 + $0x90] sm:$0xff] }
  0x20   :  { %709 = vmatpush.bf16.msra.mxu3 %v1362_v7  ;;  %v1358_v23 = vld [vmem:[#allocation6 + $0xd0] sm:$0xff]  ;;  %v1333_v24 = vld [vmem:[#allocation6 + $0x8] sm:$0xff]  ;;  %v1332_v28 = vld [vmem:[#allocation6] sm:$0xff] }
  0x21   :  { %668 = vmatpush.bf16.msra.mxu0 %v1337_v8  ;;  %v1341_v25 = vld [vmem:[#allocation6 + $0x48] sm:$0xff]  ;;  %v1340_v29 = vld [vmem:[#allocation6 + $0x40] sm:$0xff]  ;;  %v1371_v32 = vld [vmem:[#allocation6 + $0x138] sm:$0xff] }
  0x22   :  { %682 = vmatpush.bf16.msra.mxu1 %v1345_v9  ;;  %v1349_v26 = vld [vmem:[#allocation6 + $0x88] sm:$0xff]  ;;  %v1348_v30 = vld [vmem:[#allocation6 + $0x80] sm:$0xff]  ;;  %v1379_v33 = vld [vmem:[#allocation6 + $0x178] sm:$0xff] }
  0x23   :  { %696 = vmatpush.bf16.msra.mxu2 %v1353_v10  ;;  %v1357_v27 = vld [vmem:[#allocation6 + $0xc8] sm:$0xff]  ;;  %v1356_v31 = vld [vmem:[#allocation6 + $0xc0] sm:$0xff]  ;;  %v125_v34 = vld [vmem:[#allocation3 + $0x10] sm:$0xff] }
  0x24   :  { %710 = vmatpush.bf16.msra.mxu3 %v1361_v11  ;;  %v133_v35 = vld [vmem:[#allocation3 + $0x50] sm:$0xff]  ;;  %v126_v36 = vld [vmem:[#allocation3 + $0x18] sm:$0xff]  ;;  %v123_v38 = vld [vmem:[#allocation3] sm:$0xff] }
  0x25   :  { %669 = vmatpush.bf16.msra.mxu0 %v1336_v12  ;;  %v134_v37 = vld [vmem:[#allocation3 + $0x58] sm:$0xff]  ;;  %v131_v39 = vld [vmem:[#allocation3 + $0x40] sm:$0xff]  ;;  %v124_v40 = vld [vmem:[#allocation3 + $0x8] sm:$0xff]  ;;  %v141_v44 = vpack.c.bf16 %v133_v35, %v125_v34 }
  0x26   :  { %683 = vmatpush.bf16.msra.mxu1 %v1344_v13  ;;  %v132_v41 = vld [vmem:[#allocation3 + $0x48] sm:$0xff]  ;;  %v1387_v42 = vld [vmem:[#allocation6 + $0x1b8] sm:$0xff]  ;;  %v142_v45 = vpack.c.bf16 %v134_v37, %v126_v36  ;;  %v139_v46 = vpack.c.bf16 %v131_v39, %v123_v38  ;;  %v1370_v48 = vld [vmem:[#allocation6 + $0x130] sm:$0xff] }
  0x27   :  { %697 = vmatpush.bf16.msra.mxu2 %v1352_v14  ;;  %v1395_v43 = vld [vmem:[#allocation6 + $0x1f8] sm:$0xff]  ;;  %v140_v47 = vpack.c.bf16 %v132_v41, %v124_v40  ;;  %v1378_v49 = vld [vmem:[#allocation6 + $0x170] sm:$0xff]  ;;  %v1369_v52 = vld [vmem:[#allocation6 + $0x128] sm:$0xff] }
  0x28   :  { %711 = vmatpush.bf16.msra.mxu3 %v1360_v15  ;;  %v1386_v50 = vld [vmem:[#allocation6 + $0x1b0] sm:$0xff]  ;;  %v1377_v53 = vld [vmem:[#allocation6 + $0x168] sm:$0xff]  ;;  %v785_v54 = vld [vmem:[%s1770_s2] sm:$0xff] }
  0x29   :  { %670 = vmatpush.bf16.msra.mxu0 %v1335_v16  ;;  %v1394_v51 = vld [vmem:[#allocation6 + $0x1f0] sm:$0xff]  ;;  %v1385_v55 = vld [vmem:[#allocation6 + $0x1a8] sm:$0xff]  ;;  %792 = vperm.xlu0 %1425, %v785_v54   ;;  %v1368_v58 = vld [vmem:[#allocation6 + $0x120] sm:$0xff] }
  0x2a   :  { %684 = vmatpush.bf16.msra.mxu1 %v1343_v17  ;;  %v1393_v56 = vld [vmem:[#allocation6 + $0x1e8] sm:$0xff]  ;;  %v1376_v59 = vld [vmem:[#allocation6 + $0x160] sm:$0xff]  ;;  %v1367_v62 = vld [vmem:[#allocation6 + $0x118] sm:$0xff] }
  0x2b   :  { %698 = vmatpush.bf16.msra.mxu2 %v1351_v18  ;;  %v1384_v60 = vld [vmem:[#allocation6 + $0x1a0] sm:$0xff]  ;;  %v1375_v63 = vld [vmem:[#allocation6 + $0x158] sm:$0xff]  ;;  %v786_v0 = vld [vmem:[%s1770_s2 + $0x8] sm:$0xff] }
  0x2c   :  { %712 = vmatpush.bf16.msra.mxu3 %v1359_v19  ;;  %v1392_v61 = vld [vmem:[#allocation6 + $0x1e0] sm:$0xff]  ;;  %v1383_v1 = vld [vmem:[#allocation6 + $0x198] sm:$0xff]  ;;  %v1366_v3 = vld [vmem:[#allocation6 + $0x110] sm:$0xff] }
  0x2d   :  { %671 = vmatpush.bf16.msra.mxu0 %v1334_v20  ;;  %v1391_v2 = vld [vmem:[#allocation6 + $0x1d8] sm:$0xff]  ;;  %v1374_v4 = vld [vmem:[#allocation6 + $0x150] sm:$0xff]  ;;  %v1365_v7 = vld [vmem:[#allocation6 + $0x108] sm:$0xff] }
  0x2e   :  { %685 = vmatpush.bf16.msra.mxu1 %v1342_v21  ;;  %v1382_v5 = vld [vmem:[#allocation6 + $0x190] sm:$0xff]  ;;  %v1373_v8 = vld [vmem:[#allocation6 + $0x148] sm:$0xff]  ;;  %v1364_v11 = vld [vmem:[#allocation6 + $0x100] sm:$0xff] }
  0x2f   :  { %699 = vmatpush.bf16.msra.mxu2 %v1350_v22  ;;  %v1390_v6 = vld [vmem:[#allocation6 + $0x1d0] sm:$0xff]  ;;  %v1381_v9 = vld [vmem:[#allocation6 + $0x188] sm:$0xff]  ;;  %v1372_v12 = vld [vmem:[#allocation6 + $0x140] sm:$0xff] }
  0x30   :  { %713 = vmatpush.bf16.msra.mxu3 %v1358_v23  ;;  %v1389_v10 = vld [vmem:[#allocation6 + $0x1c8] sm:$0xff]  ;;  %v1380_v13 = vld [vmem:[#allocation6 + $0x180] sm:$0xff]  ;;  %v129_v19 = vld [vmem:[#allocation3 + $0x30] sm:$0xff] }
  0x31   :  { %672 = vmatpush.bf16.msra.mxu0 %v1333_v24  ;;  %797 = vperm.xlu0 %1425, %v786_v0   ;;  %v1388_v14 = vld [vmem:[#allocation6 + $0x1c0] sm:$0xff]  ;;  %v128_v17 = vld [vmem:[#allocation3 + $0x28] sm:$0xff]  ;;  %v137_v20 = vld [vmem:[#allocation3 + $0x70] sm:$0xff] }
  0x32   :  { %686 = vmatpush.bf16.msra.mxu1 %v1341_v25  ;;  %v127_v15 = vld [vmem:[#allocation3 + $0x20] sm:$0xff]  ;;  %v136_v18 = vld [vmem:[#allocation3 + $0x68] sm:$0xff]  ;;  %v130_v21 = vld [vmem:[#allocation3 + $0x38] sm:$0xff]  ;;  %v145_v25 = vpack.c.bf16 %v137_v20, %v129_v19 }
  0x33   :  { %700 = vmatpush.bf16.msra.mxu2 %v1349_v26  ;;  %v135_v16 = vld [vmem:[#allocation3 + $0x60] sm:$0xff]  ;;  %v138_v22 = vld [vmem:[#allocation3 + $0x78] sm:$0xff]  ;;  %v144_v24 = vpack.c.bf16 %v136_v18, %v128_v17 }
  0x34   :  { %714 = vmatpush.bf16.msra.mxu3 %v1357_v27  ;;  %v143_v23 = vpack.c.bf16 %v135_v16, %v127_v15  ;;  %v146_v26 = vpack.c.bf16 %v138_v22, %v130_v21 }
  0x35   :  { %673 = vmatpush.bf16.msra.mxu0 %v1332_v28 }
  0x36   :  { %687 = vmatpush.bf16.msra.mxu1 %v1340_v29 }
  0x37   :  { %701 = vmatpush.bf16.msra.mxu2 %v1348_v30 }
  0x38   :  { %715 = vmatpush.bf16.msra.mxu3 %v1356_v31  ;;  %674 = vmatmul.bf16.vlgmr.msra.gmra.mxu0 %v139_v46 }
  0x39   :  { %722 = vmatpush.bf16.msrb.mxu0 %v1371_v32  ;;  %688 = vmatmul.bf16.vlgmr.msra.gmra.mxu1 %v140_v47 }
  0x3a   :  { %736 = vmatpush.bf16.msrb.mxu1 %v1379_v33  ;;  %702 = vmatmul.bf16.vlgmr.msra.gmra.mxu2 %v141_v44  ;;  %v1426_v44 = vld [vmem:[%s1771_s3] ss:$0 sm:$0xff] }
  0x3b   :  { %750 = vmatpush.bf16.msrb.mxu2 %v1387_v42  ;;  %716 = vmatmul.bf16.vlgmr.msra.gmra.mxu3 %v142_v45 }
  0x3c   :  { %764 = vmatpush.bf16.msrb.mxu3 %v1395_v43 }
  0x3d   :  { %723 = vmatpush.bf16.msrb.mxu0 %v1370_v48  ;;  %v811_v48 = vlaneseq }
  0x3e   :  { %737 = vmatpush.bf16.msrb.mxu1 %v1378_v49 }
  0x3f   :  { %751 = vmatpush.bf16.msrb.mxu2 %v1386_v50 }
  0x40   :  { %765 = vmatpush.bf16.msrb.mxu3 %v1394_v51 }
  0x41   :  { %724 = vmatpush.bf16.msrb.mxu0 %v1369_v52 }
  0x42   :  { %738 = vmatpush.bf16.msrb.mxu1 %v1377_v53 }
  0x43   :  { %752 = vmatpush.bf16.msrb.mxu2 %v1385_v55  ;;  %v1726_v55 = vand.u32 127, %v811_v48  ;;  %v906_v48 = vld [vmem:[#allocation8 + $0x30] sm:$0xff] }
  0x44   :  { %766 = vmatpush.bf16.msrb.mxu3 %v1393_v56 }
  0x45   :  { %725 = vmatpush.bf16.msrb.mxu0 %v1368_v58  ;;  %vm813_vm0 = vcmp.lt.s32.totalorder %v1726_v55, 32 }
  0x46   :  { %739 = vmatpush.bf16.msrb.mxu1 %v1376_v59 }
  0x47   :  { %753 = vmatpush.bf16.msrb.mxu2 %v1384_v60 }
  0x48   :  { %767 = vmatpush.bf16.msrb.mxu3 %v1392_v61 }
  0x49   :  { %726 = vmatpush.bf16.msrb.mxu0 %v1367_v62 }
  0x4a   :  { %740 = vmatpush.bf16.msrb.mxu1 %v1375_v63 }
  0x4b   :  { %754 = vmatpush.bf16.msrb.mxu2 %v1383_v1 }
  0x4c   :  { %768 = vmatpush.bf16.msrb.mxu3 %v1391_v2 }
  0x4d   :  { %727 = vmatpush.bf16.msrb.mxu0 %v1366_v3 }
  0x4e   :  { %741 = vmatpush.bf16.msrb.mxu1 %v1374_v4 }
  0x4f   :  { %755 = vmatpush.bf16.msrb.mxu2 %v1382_v5 }
  0x50   :  { %769 = vmatpush.bf16.msrb.mxu3 %v1390_v6 }
  0x51   :  { %728 = vmatpush.bf16.msrb.mxu0 %v1365_v7 }
  0x52   :  { %742 = vmatpush.bf16.msrb.mxu1 %v1373_v8 }
  0x53   :  { %756 = vmatpush.bf16.msrb.mxu2 %v1381_v9 }
  0x54   :  { %770 = vmatpush.bf16.msrb.mxu3 %v1389_v10 }
  0x55   :  { %729 = vmatpush.bf16.msrb.mxu0 %v1364_v11 }
  0x56   :  { %743 = vmatpush.bf16.msrb.mxu1 %v1372_v12 }
  0x57   :  { %757 = vmatpush.bf16.msrb.mxu2 %v1380_v13 }
  0x58   :  { %771 = vmatpush.bf16.msrb.mxu3 %v1388_v14  ;;  %730 = vmatmul.bf16.vlgmr.msrb.gmra.mxu0 %v143_v23 }
  0x59   :  { %744 = vmatmul.bf16.vlgmr.msrb.gmra.mxu1 %v144_v24 }
  0x5a   :  { %758 = vmatmul.bf16.vlgmr.msrb.gmra.mxu2 %v145_v25 }
  0x5b   :  { %772 = vmatmul.bf16.vlgmr.msrb.gmra.mxu3 %v146_v26 }
  0x9b   :  { %v793_v45 = vpop.permute.xlu0 %792 }
  0x9c   :  { %v803_v52 = vadd.f32 %v1426_v44, %v793_v45  ;;  %v907_v45 = vld [vmem:[#allocation8 + $0x38] sm:$0xff] }
  0xa3   :  { %v798_v63 = vpop.permute.xlu0 %797 }
  0xa4   :  { %v804_v3 = vadd.f32 %v1426_v44, %v798_v63  ;;  %v901_v63 = vld [vmem:[#allocation8 + $0x8] sm:$0xff] }
  0xb5   :  { %v675_v27 = vpop.f32.mrf.mxu0 }
  0xb6   :  { %v689_v28 = vpop.f32.mrf.mxu1 }
  0xb7   :  { %v690_v31 = vadd.f32 %v689_v28, %v675_v27 }
  0xbd   :  { %v703_v29 = vpop.f32.mrf.mxu2  ;;  %v677_v32 = vpop.f32.mrf.mxu0 }
  0xbe   :  { %v717_v30 = vpop.f32.mrf.mxu3  ;;  %v691_v33 = vpop.f32.mrf.mxu1  ;;  %v704_v34 = vadd.f32 %v703_v29, %v690_v31 }
  0xbf   :  { %v692_v38 = vadd.f32 %v691_v33, %v677_v32  ;;  %v915_v32 = vld [vmem:[#allocation8 + $0x78] sm:$0xff]  ;;  %v914_v33 = vld [vmem:[#allocation8 + $0x70] sm:$0xff] }
  0xc0   :  { %v718_v37 = vadd.f32 %v717_v30, %v704_v34  ;;  %920 = vmatpush.msra.mxu0 %v915_v32  ;;  %1396 = vmatpush.msra.mxu3 %v915_v32  ;;  %v913_v34 = vld [vmem:[#allocation8 + $0x68] sm:$0xff] }
  0xc1   :  { %v1003_v32 = vld [vmem:[#allocation11 + $0x68] sm:$0xff] }
  0xc2   :  { %921 = vmatpush.msra.mxu0 %v914_v33  ;;  %1397 = vmatpush.msra.mxu3 %v914_v33 }
  0xc4   :  { %922 = vmatpush.msra.mxu0 %v913_v34  ;;  %1398 = vmatpush.msra.mxu3 %v913_v34  ;;  %v1002_v34 = vld [vmem:[#allocation11 + $0x60] sm:$0xff] }
  0xc5   :  { %v705_v35 = vpop.f32.mrf.mxu2 }
  0xc6   :  { %v719_v36 = vpop.f32.mrf.mxu3  ;;  %v706_v42 = vadd.f32 %v705_v35, %v692_v38  ;;  %v911_v38 = vld [vmem:[#allocation8 + $0x58] sm:$0xff] }
  0xc8   :  { %v720_v49 = vadd.f32 %v719_v36, %v706_v42  ;;  %v912_v36 = vld [vmem:[#allocation8 + $0x60] sm:$0xff] }
  0xc9   :  { %923 = vmatpush.msra.mxu0 %v912_v36  ;;  %1399 = vmatpush.msra.mxu3 %v912_v36 }
  0xcb   :  { %924 = vmatpush.msra.mxu0 %v911_v38  ;;  %1400 = vmatpush.msra.mxu3 %v911_v38 }
  0xd5   :  { %v731_v39 = vpop.f32.mrf.mxu0 }
  0xd6   :  { %v732_v40 = vadd.f32 %v731_v39, %v718_v37  ;;  %v745_v41 = vpop.f32.mrf.mxu1 }
  0xd8   :  { %v746_v43 = vadd.f32 %v745_v41, %v732_v40  ;;  %v910_v40 = vld [vmem:[#allocation8 + $0x50] sm:$0xff]  ;;  %v909_v41 = vld [vmem:[#allocation8 + $0x48] sm:$0xff] }
  0xd9   :  { %925 = vmatpush.msra.mxu0 %v910_v40  ;;  %1401 = vmatpush.msra.mxu3 %v910_v40 }
  0xdb   :  { %926 = vmatpush.msra.mxu0 %v909_v41  ;;  %1402 = vmatpush.msra.mxu3 %v909_v41 }
  0xdd   :  { %v759_v46 = vpop.f32.mrf.mxu2  ;;  %v733_v51 = vpop.f32.mrf.mxu0 }
  0xde   :  { %v773_v47 = vpop.f32.mrf.mxu3  ;;  %v760_v50 = vadd.f32 %v759_v46, %v746_v43  ;;  %v734_v54 = vadd.f32 %v733_v51, %v720_v49  ;;  %v747_v57 = vpop.f32.mrf.mxu1  ;;  %v908_v43 = vld [vmem:[#allocation8 + $0x40] sm:$0xff] }
  0xdf   :  { %927 = vmatpush.msra.mxu0 %v908_v43  ;;  %1403 = vmatpush.msra.mxu3 %v908_v43  ;;  %v999_v43 = vld [vmem:[#allocation11 + $0x48] sm:$0xff] }
  0xe0   :  { %v774_v53 = vadd.f32 %v773_v47, %v760_v50  ;;  %v748_v59 = vadd.f32 %v747_v57, %v734_v54  ;;  %v905_v50 = vld [vmem:[#allocation8 + $0x28] sm:$0xff] }
  0xe1   :  { %928 = vmatpush.msra.mxu0 %v907_v45  ;;  %1404 = vmatpush.msra.mxu3 %v907_v45  ;;  %v998_v45 = vld [vmem:[#allocation11 + $0x40] sm:$0xff] }
  0xe2   :  { %v805_v56 = vmul.f32 2.0, %v774_v53 }
  0xe3   :  { %929 = vmatpush.msra.mxu0 %v906_v48  ;;  %1405 = vmatpush.msra.mxu3 %v906_v48 }
  0xe4   :  { %v807_v58 = vsub.f32 %v803_v52, %v805_v56 }
  0xe5   :  { %v761_v60 = vpop.f32.mrf.mxu2  ;;  %930 = vmatpush.msra.mxu0 %v905_v50  ;;  %1406 = vmatpush.msra.mxu3 %v905_v50  ;;  %v997_v50 = vld [vmem:[#allocation11 + $0x38] sm:$0xff] }
  0xe6   :  { %v809_v61 = vmax.f32 %v807_v58, 0.0  ;;  %v762_v62 = vadd.f32 %v761_v60, %v748_v59  ;;  %v775_v0 = vpop.f32.mrf.mxu3  ;;  %v904_v60 = vld [vmem:[#allocation8 + $0x20] sm:$0xff] }
  0xe7   :  { %931 = vmatpush.msra.mxu0 %v904_v60  ;;  %1407 = vmatpush.msra.mxu3 %v904_v60 }
  0xe8   :  { %v776_v1 = vadd.f32 %v775_v0, %v762_v62  ;;  %v1731_v2 = vsel %vm813_vm0, %v809_v61, 3e+38  ;;  %1430 = vrsqrt.f32 %v809_v61  ;;  %vm861_vm1 = vcmp.eq.f32.partialorder %v809_v61, inf  ;;  %v902_v62 = vld [vmem:[#allocation8 + $0x10] sm:$0xff]  ;;  %v960_v0 = vld [vmem:[#allocation9 + $0x78] sm:$0xff] }
  0xe9   :  { %816 = vmin.xlane.f32.xlu0 %v1731_v2  ;;  %v864_v17 = vand.u32 2147483648, %v809_v61  ;;  %vm863_vm2 = vcmp.eq.f32.partialorder %v809_v61, 0.0  ;;  %965 = vmatpush.msra.mxu1 %v960_v0 }
  0xea   :  { %v806_v4 = vmul.f32 2.0, %v776_v1  ;;  %v959_v1 = vld [vmem:[#allocation9 + $0x70] sm:$0xff] }
  0xeb   :  { %966 = vmatpush.msra.mxu1 %v959_v1 }
  0xec   :  { %v808_v5 = vsub.f32 %v804_v3, %v806_v4  ;;  %v957_v3 = vld [vmem:[#allocation9 + $0x60] sm:$0xff]  ;;  %v956_v4 = vld [vmem:[#allocation9 + $0x58] sm:$0xff] }
  0xee   :  { %v1431_v6 = vpop.eup %1430  ;;  %v810_v7 = vmax.f32 %v808_v5, 0.0  ;;  %v955_v5 = vld [vmem:[#allocation9 + $0x50] sm:$0xff] }
  0xef   :  { %v855_v8 = vmul.f32 %v1431_v6, %v809_v61 }
  0xf0   :  { %1432 = vrsqrt.f32 %v810_v7  ;;  %vm873_vm3 = vcmp.eq.f32.partialorder %v810_v7, inf  ;;  %v876_v26 = vand.u32 2147483648, %v810_v7  ;;  %vm875_vm4 = vcmp.eq.f32.partialorder %v810_v7, 0.0 }
  0xf1   :  { %v856_v9 = vmul.f32 %v1431_v6, %v855_v8  ;;  %v815_v31 = vsel %vm813_vm0, %v810_v7, 3e+38 }
  0xf3   :  { %v857_v10 = vmul.f32 0.5, %v856_v9  ;;  %v952_v9 = vld [vmem:[#allocation9 + $0x38] sm:$0xff] }
  0xf5   :  { %v858_v11 = vsub.f32 1.5, %v857_v10  ;;  %v951_v10 = vld [vmem:[#allocation9 + $0x30] sm:$0xff] }
  0xf6   :  { %v1433_v12 = vpop.eup %1432 }
  0xf7   :  { %v859_v13 = vmul.f32 %v1431_v6, %v858_v11  ;;  %v867_v14 = vmul.f32 %v1433_v12, %v810_v7  ;;  %v954_v6 = vld [vmem:[#allocation9 + $0x48] sm:$0xff] }
  0xf8   :  { %v950_v11 = vld [vmem:[#allocation9 + $0x28] sm:$0xff] }
  0xf9   :  { %v860_v15 = vmul.f32 %v859_v13, %v809_v61  ;;  %v868_v16 = vmul.f32 %v1433_v12, %v867_v14 }
  0xfb   :  { %v862_v18 = vsel %vm861_vm1, %v809_v61, %v860_v15  ;;  %v869_v19 = vmul.f32 0.5, %v868_v16  ;;  %v903_v61 = vld [vmem:[#allocation8 + $0x18] sm:$0xff] }
  0xfc   :  { %v865_v20 = vsel %vm863_vm2, %v864_v17, %v862_v18  ;;  %932 = vmatpush.msra.mxu0 %v903_v61  ;;  %1408 = vmatpush.msra.mxu3 %v903_v61  ;;  %v992_v61 = vld [vmem:[#allocation11 + $0x10] sm:$0xff] }
  0xfd   :  { %v878_v21 = vmul.f32 -2.0, %v865_v20  ;;  %v870_v22 = vsub.f32 1.5, %v869_v19 }
  0xfe   :  { %933 = vmatpush.msra.mxu0 %v902_v62  ;;  %1409 = vmatpush.msra.mxu3 %v902_v62  ;;  %v991_v62 = vld [vmem:[#allocation11 + $0x8] sm:$0xff] }
  0xff   :  { %v880_v23 = vsel %vm813_vm0, %v878_v21, -1e+30  ;;  %v871_v24 = vmul.f32 %v1433_v12, %v870_v22 }
 0x100   :  { %882 = vmax.xlane.f32.xlu1 %v880_v23  ;;  %934 = vmatpush.msra.mxu0 %v901_v63 }
 0x101   :  { %v872_v25 = vmul.f32 %v871_v24, %v810_v7  ;;  %1410 = vmatpush.msra.mxu3 %v901_v63  ;;  %v990_v63 = vld [vmem:[#allocation11] sm:$0xff] }
 0x103   :  { %v874_v27 = vsel %vm873_vm3, %v810_v7, %v872_v25  ;;  %v953_v7 = vld [vmem:[#allocation9 + $0x40] sm:$0xff] }
 0x104   :  { %v877_v28 = vsel %vm875_vm4, %v876_v26, %v874_v27  ;;  %v949_v25 = vld [vmem:[#allocation9 + $0x20] sm:$0xff]  ;;  %v948_v26 = vld [vmem:[#allocation9 + $0x18] sm:$0xff]  ;;  %v947_v27 = vld [vmem:[#allocation9 + $0x10] sm:$0xff] }
 0x105   :  { %v879_v29 = vmul.f32 -2.0, %v877_v28  ;;  %v946_v28 = vld [vmem:[#allocation9 + $0x8] sm:$0xff] }
 0x107   :  { %v881_v30 = vsel %vm813_vm0, %v879_v29, -1e+30  ;;  %v945_v29 = vld [vmem:[#allocation9] sm:$0xff] }
 0x108   :  { %884 = vmax.xlane.f32.xlu1 %v881_v30 }
 0x110   :  { %818 = vmin.xlane.f32.xlu1 %v815_v31 }
 0x15c   :  { %v817_v49 = vpop.xlane.xlu0 %816 }
 0x15d   :  { %vm820_vm5 = vcmp.eq.f32.partialorder %v1731_v2, %v817_v49  ;;  %v958_v2 = vld [vmem:[#allocation9 + $0x68] sm:$0xff] }
 0x15e   :  { %v822_v54 = vsel %vm820_vm5, %v1726_v55, 128  ;;  %967 = vmatpush.msra.mxu1 %v958_v2 }
 0x15f   :  { %v825_v58 = vshra.s32 %v822_v54, 16  ;;  %v824_v18 = vand.u32 65535, %v822_v54  ;;  %v995_v54 = vld [vmem:[#allocation11 + $0x28] sm:$0xff] }
 0x160   :  { %968 = vmatpush.msra.mxu1 %v957_v3 }
 0x161   :  { %v827_v59 = vcvt.s32.f32 %v825_v58 }
 0x162   :  { %969 = vmatpush.msra.mxu1 %v956_v4 }
 0x164   :  { %970 = vmatpush.msra.mxu1 %v955_v5 }
 0x166   :  { %971 = vmatpush.msra.mxu1 %v954_v6  ;;  %v1429_v6 = vld [vmem:[%s1777_s9] ss:$0 sm:$0xff] }
 0x168   :  { %972 = vmatpush.msra.mxu1 %v953_v7 }
 0x16a   :  { %973 = vmatpush.msra.mxu1 %v952_v9 }
 0x16c   :  { %974 = vmatpush.msra.mxu1 %v951_v10 }
 0x16e   :  { %975 = vmatpush.msra.mxu1 %v950_v11 }
 0x170   :  { %976 = vmatpush.msra.mxu1 %v949_v25 }
 0x172   :  { %977 = vmatpush.msra.mxu1 %v948_v26 }
 0x173   :  { %v883_v35 = vpop.xlane.xlu1 %882 }
 0x174   :  { %v886_v37 = vsub.f32 %v880_v23, %v883_v35  ;;  %v826_v23 = vcvt.s32.f32 %v824_v18  ;;  %978 = vmatpush.msra.mxu1 %v947_v27  ;;  %v1001_v35 = vld [vmem:[#allocation11 + $0x58] sm:$0xff] }
 0x176   :  { %v888_v39 = vmul.f32 1.442695, %v886_v37  ;;  %979 = vmatpush.msra.mxu1 %v946_v28 }
 0x178   :  { %1434 = vpow2.f32 %v888_v39  ;;  %980 = vmatpush.msra.mxu1 %v945_v29  ;;  %v1000_v39 = vld [vmem:[#allocation11 + $0x50] sm:$0xff] }
 0x17b   :  { %v885_v42 = vpop.xlane.xlu1 %884 }
 0x17c   :  { %v887_v44 = vsub.f32 %v881_v30, %v885_v42  ;;  %v1005_v30 = vld [vmem:[#allocation11 + $0x78] sm:$0xff]  ;;  %v1427_v42 = vld [vmem:[%s1773_s5] ss:$0 sm:$0xff] }
 0x17d   :  { %1010 = vmatpush.msra.mxu2 %v1005_v30 }
 0x17e   :  { %v1740_v46 = vpop.eup %1434  ;;  %v890_v47 = vmul.f32 1.442695, %v887_v44 }
 0x17f   :  { %892 = vadd.xlane.f32.xlu2 %v1740_v46 }
 0x180   :  { %1436 = vpow2.f32 %v890_v47 }
 0x183   :  { %v819_v51 = vpop.xlane.xlu1 %818 }
 0x184   :  { %vm821_vm6 = vcmp.eq.f32.partialorder %v815_v31, %v819_v51  ;;  %v1004_v31 = vld [vmem:[#allocation11 + $0x70] sm:$0xff] }
 0x185   :  { %v823_v52 = vsel %vm821_vm6, %v1726_v55, 128  ;;  %v900_v55 = vld [vmem:[#allocation8] sm:$0xff]  ;;  %1011 = vmatpush.msra.mxu2 %v1004_v31 }
 0x186   :  { %v1437_v53 = vpop.eup %1436  ;;  %v839_v56 = vshra.s32 %v823_v52, 16  ;;  %935 = vmatpush.msra.mxu0 %v900_v55  ;;  %1411 = vmatpush.msra.mxu3 %v900_v55  ;;  %v838_v13 = vand.u32 65535, %v823_v52  ;;  %v1428_v55 = vld [vmem:[%s1775_s7] ss:$0 sm:$0xff] }
 0x187   :  { %894 = vadd.xlane.f32.xlu2 %v1437_v53  ;;  %1012 = vmatpush.msra.mxu2 %v1003_v32 }
 0x188   :  { %v841_v57 = vcvt.s32.f32 %v839_v56  ;;  %v840_v17 = vcvt.s32.f32 %v838_v13  ;;  %v994_v56 = vld [vmem:[#allocation11 + $0x20] sm:$0xff] }
 0x189   :  { %1013 = vmatpush.msra.mxu2 %v1002_v34 }
 0x18a   :  { %842 = vmin.xlane.f32.xlu1 %v841_v57 }
 0x18b   :  { %1014 = vmatpush.msra.mxu2 %v1001_v35 }
 0x18d   :  { %1015 = vmatpush.msra.mxu2 %v1000_v39 }
 0x18f   :  { %828 = vmin.xlane.f32.xlu2 %v827_v59  ;;  %1016 = vmatpush.msra.mxu2 %v999_v43 }
 0x191   :  { %1017 = vmatpush.msra.mxu2 %v998_v45 }
 0x193   :  { %1018 = vmatpush.msra.mxu2 %v997_v50 }
 0x1f2   :  { %v893_v8 = vpop.xlane.xlu2 %892 }
 0x1f3   :  { %1438 = vrcp.f32 %v893_v8 }
 0x1f9   :  { %v1439_v12 = vpop.eup %1438 }
 0x1fa   :  { %v895_v14 = vpop.xlane.xlu2 %894  ;;  %v898_v15 = vmul.f32 %v1439_v12, %v1740_v46 }
 0x1fb   :  { %1440 = vrcp.f32 %v895_v14 }
 0x1fc   :  { %936 = vmatmul.f32.vlgmr.msra.gmra.mxu0 %v898_v15 }
 0x1fd   :  { %v843_v16 = vpop.xlane.xlu1 %842 }
 0x1fe   :  { %vm844_vm7 = vcmp.eq.f32.partialorder %v841_v57, %v843_v16  ;;  %v849_v33 = vcvt.f32.s32 %v843_v16  ;;  %v993_v57 = vld [vmem:[#allocation11 + $0x18] sm:$0xff] }
 0x1ff   :  { %v845_v19 = vsel %vm844_vm7, %v840_v17, inf }
 0x200   :  { %846 = vmin.xlane.f32.xlu1 %v845_v19  ;;  %v850_v37 = vshll.u32 %v849_v33, 16 }
 0x201   :  { %v1441_v20 = vpop.eup %1440 }
 0x202   :  { %v829_v21 = vpop.xlane.xlu2 %828  ;;  %v899_v22 = vmul.f32 %v1441_v20, %v1437_v53  ;;  %v996_v53 = vld [vmem:[#allocation11 + $0x30] sm:$0xff] }
 0x203   :  { %vm830_vm8 = vcmp.eq.f32.partialorder %v827_v59, %v829_v21  ;;  %v835_v40 = vcvt.f32.s32 %v829_v21  ;;  %1019 = vmatpush.msra.mxu2 %v996_v53 }
 0x204   :  { %939 = vmatmul.f32.vlgmr.msra.gmra.mxu3 %v899_v22  ;;  %v831_v24 = vsel %vm830_vm8, %v826_v23, inf }
 0x205   :  { %832 = vmin.xlane.f32.xlu2 %v831_v24  ;;  %v836_v46 = vshll.u32 %v835_v40, 16  ;;  %1020 = vmatpush.msra.mxu2 %v995_v54 }
 0x207   :  { %1021 = vmatpush.msra.mxu2 %v994_v56 }
 0x209   :  { %1022 = vmatpush.msra.mxu2 %v993_v57 }
 0x20b   :  { %1023 = vmatpush.msra.mxu2 %v992_v61 }
 0x20d   :  { %1024 = vmatpush.msra.mxu2 %v991_v62 }
 0x20f   :  { %1025 = vmatpush.msra.mxu2 %v990_v63 }
 0x273   :  { %v847_v36 = vpop.xlane.xlu1 %846 }
 0x274   :  { %v848_v38 = vcvt.f32.s32 %v847_v36 }
 0x276   :  { %v851_v41 = vadd.s32 %v850_v37, %v848_v38 }
 0x278   :  { %853 = vst [vmem:[#allocation13 + $0x8] sm:$0xff] %v851_v41  ;;  %v833_v44 = vpop.xlane.xlu2 %832 }
 0x279   :  { %v834_v47 = vcvt.f32.s32 %v833_v44  ;;  %v937_v48 = vpop.f32.mrf.mxu0 }
 0x27a   :  { %v938_v49 = vadd.f32 %v1427_v42, %v937_v48 }
 0x27b   :  { %v837_v51 = vadd.s32 %v836_v46, %v834_v47 }
 0x27c   :  { %v943_v52 = vmax.f32 %v938_v49, 0.0 }
 0x27d   :  { %852 = vst [vmem:[#allocation13] sm:$0xff] %v837_v51 }
 0x27e   :  { %981 = vmatmul.f32.vlgmr.msra.gmra.mxu1 %v943_v52  ;;  %1060 = dma.vmem_to_hbm [thread:$0]  %s1053_s12, 256, %s1055_s16, [#allocation14], %s1624_s1, %s1624_s1, %s1625_s13  }
 0x287   :  { %v940_v58 = vpop.f32.mrf.mxu3 }
 0x288   :  { %v941_v59 = vadd.f32 %v1427_v42, %v940_v58 }
 0x28a   :  { %v944_v60 = vmax.f32 %v941_v59, 0.0 }
 0x28c   :  { %984 = vmatmul.f32.gmra.mxu1 %v944_v60 }
 0x2fb   :  { %v982_v0 = vpop.f32.mrf.mxu1 }
 0x2fc   :  { %v983_v1 = vadd.f32 %v1428_v55, %v982_v0 }
 0x2fe   :  { %v988_v2 = vmax.f32 %v983_v1, 0.0 }
 0x300   :  { %1026 = vmatmul.f32.vlgmr.msra.gmra.mxu2 %v988_v2 }
 0x309   :  { %v985_v3 = vpop.f32.mrf.mxu1 }
 0x30a   :  { %v986_v4 = vadd.f32 %v1428_v55, %v985_v3 }
 0x30c   :  { %v989_v5 = vmax.f32 %v986_v4, 0.0 }
 0x30e   :  { %1029 = vmatmul.f32.gmra.mxu2 %v989_v5 }
 0x383   :  { %v1027_v7 = vpop.f32.mrf.mxu2 }
 0x384   :  { %v1028_v8 = vadd.f32 %v1429_v6, %v1027_v7 }
 0x386   :  { %1033 = vst [vmem:[#allocation12] sm:$0xff] %v1028_v8 }
 0x391   :  { %v1030_v9 = vpop.f32.mrf.mxu2 }
 0x392   :  { %v1031_v10 = vadd.f32 %v1429_v6, %v1030_v9 }
 0x394   :  { %1034 = vst [vmem:[#allocation12 + $0x8] sm:$0xff] %v1031_v10 }
 0x395   :  { %1047 = dma.vmem_to_hbm [thread:$0]  %s1040_s18, 256, %s1042_s20, [#allocation5], %s1624_s1, %s1624_s1, %s1625_s13  }
 0x396   :  { %1616 = dma.done.wait [#allocation5], 256  }
 0x397   :  { %1617 = vsyncadd [#allocation5], 4294967040 }
 0x398   :  { %1618 = dma.done.wait [#allocation14], 256  }
 0x399   :  { %1619 = vsyncadd [#allocation14], 4294967040 }
 0x39a   :  { %1069 = vsyncpa [#allocation4], 1 }
 0x39b   :  { %1070 = vsyncpa [#allocation7], 1 }
 0x39c   :  { %1071 = vsyncpa [#allocation10], 1 }
 0x39d   :  { %1072 = vsyncpa [#allocation5], 1 }
 0x39e   :  { %1073 = vsyncpa [#allocation14], 1 }

</bundles_post_ra>
